<compile_context>
chip_gen: v5e
topology: v5e:2x2
jax: 0.10.0
libtpu: 0.0.40
codegen_flags: <defaults>
</compile_context>

<pallas_src>
import functools

import numpy as np
import jax
import jax.numpy as jnp
from jax import lax
from jax.experimental import pallas as pl
from jax.experimental.pallas import tpu as pltpu  # noqa: F401  (kept for CompilerParams if tiling is reintroduced)


# Summary lanes: 0 = mean weighted CE, 1 = L1 sum, 2 = sum(1-GIoU),
#                3 = accuracy [%], 4 = cardinality error, 5 = sum of CE weights (debug).
_SUMMARY_LANES = 128


def _round_up(x, m):
    return ((x + m - 1) // m) * m


# --------------------------------------------------------------------------------------- #
# Fused kernel: per-layer weighted CE + argmax + accuracy + cardinality + box L1/GIoU sums
# --------------------------------------------------------------------------------------- #
def _criterion_kernel(logits_ref, pidx_ref, mlab_ref, vrow_ref, pb_ref, tb_ref,
                      bid_ref, tcard_ref, summary_ref, pred_cls_ref, *,
                      num_classes, no_obj_weight, num_valid_slots):
    num_layers, c1, npad = logits_ref.shape
    mp = pidx_ref.shape[0]
    nbatch = tcard_ref.shape[0]

    # Hoisted constants / broadcasts (built once, reused by every unrolled layer).
    col_iota = lax.broadcasted_iota(jnp.int32, (1, npad), 1)
    valid_col = col_iota < num_valid_slots                        # (1, Np)  padded lanes -> False
    slot_iota = lax.broadcasted_iota(jnp.int32, (mp, npad), 1)    # (Mp, Np)
    cls_iota = lax.broadcasted_iota(jnp.int32, (c1, npad), 0)     # (C1, Np)
    lane_iota = lax.broadcasted_iota(jnp.int32, (1, _SUMMARY_LANES), 1)
    b_iota = lax.broadcasted_iota(jnp.int32, (nbatch, npad), 0)   # (B, Np)

    pidx_all = pidx_ref[...]                                      # (Mp, L) int32, -1 = padding
    mlab_all = mlab_ref[...]                                      # (Mp, L) int32
    tcard = tcard_ref[...].astype(jnp.float32)                    # (B, 1)

    # Statically unrolled over decoder layers: all data already resident in VMEM, so this
    # is pure VPU work with no per-layer DMA / launch overhead.
    for l in range(num_layers):
        # -------- per-slot target class from the matching (in-kernel scatter) --------
        pidx_col = pidx_all[:, l:l + 1]                           # (Mp, 1)
        lbl_col = mlab_all[:, l:l + 1]                            # (Mp, 1)
        hits = slot_iota == pidx_col                              # (Mp, Np) one-hot of matched slots
        tgt_from = jnp.sum(jnp.where(hits, lbl_col, 0), axis=0, keepdims=True)     # (1, Np)
        matched = jnp.sum(jnp.where(hits, 1, 0), axis=0, keepdims=True)            # (1, Np)
        tgt = jnp.where(matched > 0, tgt_from, num_classes)                        # (1, Np)

        # per-slot CE weight: 1 (foreground), no_obj_weight (background), 0 (padded lane)
        w = jnp.where(valid_col,
                      jnp.where(tgt == num_classes, no_obj_weight, 1.0),
                      0.0)                                        # (1, Np) f32

        # -------- weighted cross-entropy + argmax (class-major [C1, Np]) --------
        logits = logits_ref[l].astype(jnp.float32)                # (C1, Np)
        tgt_mask = cls_iota == tgt                                # (C1, Np)
        row_max = jnp.max(logits, axis=0, keepdims=True)          # (1, Np)
        lse = row_max + jnp.log(jnp.sum(jnp.exp(logits - row_max), axis=0, keepdims=True))
        tgt_logit = jnp.sum(jnp.where(tgt_mask, logits, 0.0), axis=0, keepdims=True)

        nll_sum = jnp.sum(w * (lse - tgt_logit))
        w_sum = jnp.sum(w)
        # F.cross_entropy(weight=...) 'mean' divides by the sum of the per-target weights.
        loss_class = nll_sum / jnp.maximum(w_sum, 1e-12)

        # argmax over classes (first index attaining the max), reusing row_max
        cand = jnp.where(logits == row_max, cls_iota, c1)
        pred = jnp.min(cand, axis=0, keepdims=True)               # (1, Np) int32
        pred_cls_ref[l] = pred                                    # full-width lane-dense store

        # -------- accuracy over matched slots (no wrapper-side gathers) --------
        vmatch = pidx_col >= 0                                    # (Mp, 1)
        pred_at = jnp.sum(jnp.where(hits, pred, 0), axis=1, keepdims=True)          # (Mp, 1)
        correct = jnp.sum(jnp.where(vmatch & (pred_at == lbl_col), 1.0, 0.0))
        n_match = jnp.sum(jnp.where(vmatch, 1.0, 0.0))
        accuracy = jnp.where(n_match > 0,
                             100.0 * correct / jnp.maximum(n_match, 1.0),
                             100.0)

        # -------- cardinality error (no host-built assign matrix / matvec) --------
        bid = bid_ref[l]                                          # (1, Np) int32 (-1 on padded lanes)
        pred_obj = jnp.where(valid_col & (pred != num_classes), 1.0, 0.0)            # (1, Np)
        card = jnp.sum(jnp.where(b_iota == bid, pred_obj, 0.0), axis=1, keepdims=True)  # (B, 1)
        card_err = jnp.sum(jnp.abs(card - tcard)) / float(nbatch)

        # -------- matched-box L1 / GIoU, coord-major [4, Mp], x/y paired --------
        vrow = vrow_ref[l]                                        # (1, Mp)  0 on padded match rows
        p = pb_ref[l].astype(jnp.float32)                         # (4, Mp)  cxcywh
        t = tb_ref[l].astype(jnp.float32)

        l1_sum = jnp.sum(jnp.abs(p - t) * vrow)

        p_lo = p[0:2, :] - 0.5 * p[2:4, :]                        # (2, Mp) corners, x/y paired
        p_hi = p[0:2, :] + 0.5 * p[2:4, :]
        t_lo = t[0:2, :] - 0.5 * t[2:4, :]
        t_hi = t[0:2, :] + 0.5 * t[2:4, :]

        wh_p = p_hi - p_lo
        wh_t = t_hi - t_lo
        area_p = wh_p[0:1, :] * wh_p[1:2, :]
        area_t = wh_t[0:1, :] * wh_t[1:2, :]

        iw_ih = jnp.maximum(jnp.minimum(p_hi, t_hi) - jnp.maximum(p_lo, t_lo), 0.0)
        inter = iw_ih[0:1, :] * iw_ih[1:2, :]
        union = area_p + area_t - inter
        iou = inter / jnp.maximum(union, 1e-7)

        e_wh = jnp.maximum(p_hi, t_hi) - jnp.minimum(p_lo, t_lo)
        area_e = e_wh[0:1, :] * e_wh[1:2, :]
        giou = iou - (area_e - union) / jnp.maximum(area_e, 1e-7)
        giou_sum = jnp.sum((1.0 - giou) * vrow)

        # -------- pack per-layer scalars into one lane-dense summary row --------
        row = jnp.where(lane_iota == 0, loss_class, 0.0)
        row = jnp.where(lane_iota == 1, l1_sum, row)
        row = jnp.where(lane_iota == 2, giou_sum, row)
        row = jnp.where(lane_iota == 3, accuracy, row)
        row = jnp.where(lane_iota == 4, card_err, row)
        row = jnp.where(lane_iota == 5, w_sum, row)
        summary_ref[l] = row


def fused_criterion_losses(logits_cm, pidx_cm, mlab_cm, vrow, pb_cm, tb_cm, bid, tcard, *,
                           num_classes, no_obj_weight, num_valid_slots):
    """One gridless pallas_call computing all per-layer losses / analyses.

    Args:
      logits_cm: [L, C1, Np] class-major logits, Np = N padded to a multiple of 128 (zeros).
      pidx_cm:   [Mp, L] int32 matched prediction slot index per match (-1 = padding row).
      mlab_cm:   [Mp, L] int32 matched target label per match.
      vrow:      [L, 1, Mp] f32 validity of each match row (0 on padding).
      pb_cm:     [L, 4, Mp] matched predicted boxes, coordinate-major cxcywh.
      tb_cm:     [L, 4, Mp] matched target boxes, coordinate-major cxcywh.
      bid:       [L, 1, Np] int32 batch id per prediction slot (-1 on padded lanes).
      tcard:     [B, 1] f32 target cardinality per batch entry.

    Returns:
      summary:   [L, 128] f32 per-layer scalars (see _SUMMARY_LANES comment).
      pred_cls:  [L, N]   int32 per-slot argmax classes (padded lanes removed).
    """
    L, C1, Np = logits_cm.shape
    Mp = pidx_cm.shape[0]
    B = tcard.shape[0]

    kernel = functools.partial(
        _criterion_kernel,
        num_classes=int(num_classes),
        no_obj_weight=float(no_obj_weight),
        num_valid_slots=int(num_valid_slots))

    in_bytes = sum(int(np.prod(a.shape)) * a.dtype.itemsize
                   for a in (logits_cm, pidx_cm, mlab_cm, vrow, pb_cm, tb_cm, bid, tcard))
    out_bytes = L * _SUMMARY_LANES * 4 + L * Np * 4
    flops = int(L * (12 * C1 * Np + 10 * Mp * Np + 4 * B * Np + 80 * Mp + 8 * Np))
    transcendentals = int(L * (C1 + 1) * Np)

    summary, pred_cls = pl.pallas_call(
        kernel,
        out_shape=(
            jax.ShapeDtypeStruct((L, 1, _SUMMARY_LANES), jnp.float32),
            jax.ShapeDtypeStruct((L, 1, Np), jnp.int32),
        ),
        cost_estimate=pl.CostEstimate(
            flops=flops, transcendentals=transcendentals,
            bytes_accessed=in_bytes + out_bytes),
    )(logits_cm, pidx_cm, mlab_cm, vrow, pb_cm, tb_cm, bid, tcard)

    return summary[:, 0, :], pred_cls[:, 0, :num_valid_slots]


# --------------------------------------------------------------------------------------- #
# Stand-in matcher (identity matching inside each batch entry)
# --------------------------------------------------------------------------------------- #
# TODO(synk): real Hungarian matching (scipy.optimize.linear_sum_assignment) has no clean
#             Pallas equivalent; a deterministic per-batch identity matcher is used instead.
def simple_matcher(out_dict, tgt_dict):
    pred_sizes = np.asarray(out_dict['sizes'])
    tgt_sizes = np.asarray(tgt_dict['sizes'])
    pred_idx, tgt_idx = [], []
    for i in range(len(tgt_sizes) - 1):
        n = int(min(pred_sizes[i + 1] - pred_sizes[i], tgt_sizes[i + 1] - tgt_sizes[i]))
        pred_idx.append(np.arange(pred_sizes[i], pred_sizes[i] + n, dtype=np.int32))
        tgt_idx.append(np.arange(tgt_sizes[i], tgt_sizes[i] + n, dtype=np.int32))
    return np.concatenate(pred_idx), np.concatenate(tgt_idx)


# --------------------------------------------------------------------------------------- #
# SetCriterion (JAX / Pallas)
# --------------------------------------------------------------------------------------- #
class SetCriterion:
    """DETR-style set criterion; all per-layer losses/analyses in one fused Pallas kernel."""

    def __init__(self, num_classes, matcher, weight_dict, no_obj_weight, loss_names, analysis_names):
        self.num_classes = int(num_classes)
        self.matcher = matcher
        self.weight_dict = weight_dict
        self.no_obj_weight = float(no_obj_weight)
        self.loss_names = list(loss_names)
        self.analysis_names = list(analysis_names)
        # Kept for API parity; the kernel bakes the {1, no_obj_weight} weighting directly.
        self.class_weights = jnp.ones(num_classes + 1, jnp.float32).at[-1].set(no_obj_weight)

    def forward(self, out_list, tgt_dict):
        loss_dict, analysis_dict = {}, {}
        if not out_list:
            return loss_dict, analysis_dict

        use_labels = 'labels' in self.loss_names
        use_boxes = 'boxes' in self.loss_names

        L = len(out_list)
        N, C1 = out_list[0]['logits'].shape
        Np = _round_up(N, 128)

        # ---- 1) matching + host-side (numpy) index plumbing: no per-layer device ops ----
        matches = [self.matcher(o, tgt_dict) for o in out_list]
        pidx_np = [np.asarray(m[0]).astype(np.int32).reshape(-1) for m in matches]
        tidx_np = [np.asarray(m[1]).astype(np.int32).reshape(-1) for m in matches]
        Mp = max(1, max(int(p.shape[0]) for p in pidx_np))

        pidx_pad = np.full((L, Mp), -1, np.int32)
        tidx_pad = np.zeros((L, Mp), np.int32)
        for l in range(L):
            m = int(pidx_np[l].shape[0])
            pidx_pad[l, :m] = pidx_np[l]
            tidx_pad[l, :m] = tidx_np[l]
        vrow_np = (pidx_pad >= 0).astype(np.float32)[:, None, :]            # (L, 1, Mp)

        bid_np = np.full((L, 1, Np), -1, np.int32)                           # batch id per slot
        for l, o in enumerate(out_list):
            ps = np.asarray(o['sizes']).astype(np.int64)
            rep = np.repeat(np.arange(ps.shape[0] - 1), np.diff(ps))
            bid_np[l, 0, :min(N, rep.shape[0])] = rep[:N]
        ts = np.asarray(tgt_dict['sizes']).astype(np.int64)
        tcard_np = np.diff(ts).astype(np.float32)[:, None]                   # (B, 1)

        # ---- 2) vectorized device plumbing (op count independent of L) ----
        logits_cm = jnp.swapaxes(jnp.stack([o['logits'] for o in out_list], 0), 1, 2)  # (L, C1, N)
        logits_cm = jnp.pad(logits_cm, ((0, 0), (0, 0), (0, Np - N)))                  # (L, C1, Np)

        if 'labels' in tgt_dict and tgt_dict['labels'].shape[0] > 0:
            tgt_labels = jnp.asarray(tgt_dict['labels']).astype(jnp.int32)
        else:
            tgt_labels = jnp.zeros((1,), jnp.int32)
        mlab_cm = tgt_labels[jnp.asarray(np.minimum(tidx_pad.T, tgt_labels.shape[0] - 1))]  # (Mp, L)
        pidx_cm = jnp.asarray(pidx_pad.T)                                                   # (Mp, L)

        if use_boxes and tgt_dict['boxes'].shape[0] > 0:
            boxes_stk = jnp.stack([o['boxes'] for o in out_list], 0)                        # (L, N, 4)
            gidx = jnp.asarray(np.maximum(pidx_pad, 0))
            pb_cm = jnp.swapaxes(boxes_stk[jnp.arange(L)[:, None], gidx], 1, 2)             # (L, 4, Mp)
            tgt_boxes = jnp.asarray(tgt_dict['boxes'])
            tclamp = np.minimum(np.maximum(tidx_pad, 0), int(tgt_boxes.shape[0]) - 1)
            tb_cm = jnp.swapaxes(tgt_boxes[jnp.asarray(tclamp)], 1, 2)                      # (L, 4, Mp)
        else:
            pb_cm = jnp.full((L, 4, Mp), 0.5, jnp.float32)   # dummy valid boxes, masked by vrow=0
            tb_cm = pb_cm
            vrow_np = np.zeros_like(vrow_np)

        # ---- 3) one fused Pallas kernel over all decoder layers ----
        summary, _pred_cls = fused_criterion_losses(
            logits_cm, pidx_cm, mlab_cm, jnp.asarray(vrow_np), pb_cm, tb_cm,
            jnp.asarray(bid_np), jnp.asarray(tcard_np),
            num_classes=self.num_classes, no_obj_weight=self.no_obj_weight,
            num_valid_slots=N)

        # TODO(synk): num_boxes should be Boxes.dist_len() (cross-host reduce); local count used.
        num_boxes = float(tgt_dict['boxes'].shape[0]) if use_boxes else 1.0
        num_boxes = max(num_boxes, 1.0)

        # ---- 4) assemble per-layer loss / analysis dicts (tiny scalar slices only) ----
        for l, o in enumerate(out_list):
            lid = o['layer_id']
            if use_labels:
                loss_dict[f'loss_class_{lid}'] = self.weight_dict['class'] * summary[l, 0]
                if 'accuracy' in self.analysis_names:
                    analysis_dict[f'accuracy_{lid}'] = summary[l, 3]
                if 'cardinality' in self.analysis_names:
                    analysis_dict[f'card_error_{lid}'] = summary[l, 4]
            if use_boxes:
                loss_dict[f'loss_l1_{lid}'] = self.weight_dict['l1'] * (summary[l, 1] / num_boxes)
                loss_dict[f'loss_giou_{lid}'] = self.weight_dict['giou'] * (summary[l, 2] / num_boxes)
            if 'curio_loss' in o:
                loss_dict[f'loss_curio_{lid}'] = o['curio_loss']

        return loss_dict, analysis_dict

    __call__ = forward


# --------------------------------------------------------------------------------------- #
# Demo
# --------------------------------------------------------------------------------------- #
if __name__ == "__main__":
    key = jax.random.PRNGKey(0)
    num_classes = 4
    batch_size = 2
    slots_per_img = 8
    num_slots_total = batch_size * slots_per_img              # 16
    tgt_counts = np.array([3, 5], dtype=np.int64)
    num_targets_total = int(tgt_counts.sum())                  # 8

    pred_sizes = np.concatenate([[0], np.cumsum(np.full(batch_size, slots_per_img))]).astype(np.int64)
    tgt_sizes = np.concatenate([[0], np.cumsum(tgt_counts)]).astype(np.int64)

    k1, k2, k3, k4, k5, k6 = jax.random.split(key, 6)

    def rand_boxes(k, n):
        kc, ks = jax.random.split(k)
        centers = jax.random.uniform(kc, (n, 2), minval=0.25, maxval=0.75)
        sizes = jax.random.uniform(ks, (n, 2), minval=0.05, maxval=0.30)
        return jnp.concatenate([centers, sizes], axis=-1)      # cxcywh, valid boxes

    out_list = []
    for layer_id, (kl, kb) in enumerate([(k1, k2), (k3, k4)]):
        out_list.append({
            'logits': jax.random.normal(kl, (num_slots_total, num_classes + 1), jnp.float32),
            'boxes': rand_boxes(kb, num_slots_total),
            'sizes': pred_sizes,
            'layer_id': layer_id,
        })
    out_list[1]['curio_loss'] = jnp.float32(0.125)

    tgt_dict = {
        'labels': jax.random.randint(k5, (num_targets_total,), 0, num_classes, dtype=jnp.int32),
        'boxes': rand_boxes(k6, num_targets_total),
        'sizes': tgt_sizes,
    }

    criterion = SetCriterion(
        num_classes=num_classes,
        matcher=simple_matcher,
        weight_dict={'class': 1.0, 'l1': 5.0, 'giou': 2.0},
        no_obj_weight=0.1,
        loss_names=['labels', 'boxes'],
        analysis_names=['accuracy', 'cardinality'],
    )

    loss_dict, analysis_dict = criterion(out_list, tgt_dict)
    jax.block_until_ready(jax.tree_util.tree_leaves(loss_dict))
    jax.block_until_ready(jax.tree_util.tree_leaves(analysis_dict))
    print("KERNEL_OK")
</pallas_src>

<mosaic_0001>
module attributes {stable_mosaic.version = 11 : i64} {
  func.func @_criterion_kernel(%arg0: memref<2x5x128xf32, #tpu.memory_space<vmem>>, %arg1: memref<8x2xi32, #tpu.memory_space<vmem>>, %arg2: memref<8x2xi32, #tpu.memory_space<vmem>>, %arg3: memref<2x1x8xf32, #tpu.memory_space<vmem>>, %arg4: memref<2x4x8xf32, #tpu.memory_space<vmem>>, %arg5: memref<2x4x8xf32, #tpu.memory_space<vmem>>, %arg6: memref<2x1x128xi32, #tpu.memory_space<vmem>>, %arg7: memref<2x1xf32, #tpu.memory_space<vmem>>, %arg8: memref<2x1x128xf32, #tpu.memory_space<vmem>>, %arg9: memref<2x1x128xi32, #tpu.memory_space<vmem>>) attributes {dimension_semantics = [], scalar_prefetch = 0 : i64, scratch_operands = 0 : i64, tpu.core_type = #tpu.core_type<tc>} {
    %0 = tpu.iota {dimensions = array<i32: 1>} : vector<1x128xi32>
    %c16_i32 = arith.constant 16 : i32
    %1 = vector.broadcast %c16_i32 : i32 to vector<1x128xi32>
    %2 = arith.cmpi slt, %0, %1 : vector<1x128xi32>
    %3 = tpu.iota {dimensions = array<i32: 1>} : vector<8x128xi32>
    %4 = tpu.iota {dimensions = array<i32: 0>} : vector<5x128xi32>
    %5 = tpu.iota {dimensions = array<i32: 1>} : vector<1x128xi32>
    %6 = tpu.iota {dimensions = array<i32: 0>} : vector<2x128xi32>
    %c0 = arith.constant 0 : index
    %c0_0 = arith.constant 0 : index
    %7 = vector.load %arg1[%c0, %c0_0] : memref<8x2xi32, #tpu.memory_space<vmem>>, vector<8x2xi32>
    %c0_1 = arith.constant 0 : index
    %c0_2 = arith.constant 0 : index
    %8 = vector.load %arg2[%c0_1, %c0_2] : memref<8x2xi32, #tpu.memory_space<vmem>>, vector<8x2xi32>
    %c0_3 = arith.constant 0 : index
    %c0_4 = arith.constant 0 : index
    %9 = vector.load %arg7[%c0_3, %c0_4] : memref<2x1xf32, #tpu.memory_space<vmem>>, vector<2x1xf32>
    %10 = vector.extract_strided_slice %7 {offsets = [0, 0], sizes = [8, 1], strides = [1, 1]} : vector<8x2xi32> to vector<8x1xi32>
    %11 = vector.extract_strided_slice %8 {offsets = [0, 0], sizes = [8, 1], strides = [1, 1]} : vector<8x2xi32> to vector<8x1xi32>
    %12 = vector.broadcast %10 : vector<8x1xi32> to vector<8x128xi32>
    %13 = arith.cmpi eq, %3, %12 : vector<8x128xi32>
    %c0_i32 = arith.constant 0 : i32
    %14 = vector.shape_cast %11 : vector<8x1xi32> to vector<8x1xi32>
    %15 = vector.broadcast %14 : vector<8x1xi32> to vector<8x128xi32>
    %16 = vector.broadcast %c0_i32 : i32 to vector<8x128xi32>
    %17 = arith.select %13, %15, %16 : vector<8x128xi1>, vector<8x128xi32>
    %cst = arith.constant dense<0> : vector<128xi32>
    %18 = vector.multi_reduction <add>, %17, %cst [0] : vector<8x128xi32> to vector<128xi32>
    %19 = vector.shape_cast %18 : vector<128xi32> to vector<1x128xi32>
    %c1_i32 = arith.constant 1 : i32
    %c0_i32_5 = arith.constant 0 : i32
    %20 = vector.broadcast %c1_i32 : i32 to vector<8x128xi32>
    %21 = vector.broadcast %c0_i32_5 : i32 to vector<8x128xi32>
    %22 = arith.select %13, %20, %21 : vector<8x128xi1>, vector<8x128xi32>
    %cst_6 = arith.constant dense<0> : vector<128xi32>
    %23 = vector.multi_reduction <add>, %22, %cst_6 [0] : vector<8x128xi32> to vector<128xi32>
    %24 = vector.shape_cast %23 : vector<128xi32> to vector<1x128xi32>
    %c0_i32_7 = arith.constant 0 : i32
    %25 = vector.broadcast %c0_i32_7 : i32 to vector<1x128xi32>
    %26 = arith.cmpi sgt, %24, %25 : vector<1x128xi32>
    %c4_i32 = arith.constant 4 : i32
    %27 = vector.broadcast %c4_i32 : i32 to vector<1x128xi32>
    %28 = arith.select %26, %19, %27 : vector<1x128xi1>, vector<1x128xi32>
    %c4_i32_8 = arith.constant 4 : i32
    %29 = vector.broadcast %c4_i32_8 : i32 to vector<1x128xi32>
    %30 = arith.cmpi eq, %28, %29 : vector<1x128xi32>
    %cst_9 = arith.constant 1.000000e-01 : f32
    %cst_10 = arith.constant 1.000000e+00 : f32
    %31 = vector.broadcast %cst_9 : f32 to vector<1x128xf32>
    %32 = vector.broadcast %cst_10 : f32 to vector<1x128xf32>
    %33 = arith.select %30, %31, %32 : vector<1x128xi1>, vector<1x128xf32>
    %cst_11 = arith.constant 0.000000e+00 : f32
    %34 = vector.broadcast %cst_11 : f32 to vector<1x128xf32>
    %35 = arith.select %2, %33, %34 : vector<1x128xi1>, vector<1x128xf32>
    %c0_12 = arith.constant 0 : index
    %c0_13 = arith.constant 0 : index
    %c0_14 = arith.constant 0 : index
    %36 = vector.load %arg0[%c0_12, %c0_13, %c0_14] : memref<2x5x128xf32, #tpu.memory_space<vmem>>, vector<1x5x128xf32>
    %37 = vector.shape_cast %36 : vector<1x5x128xf32> to vector<5x128xf32>
    %38 = vector.broadcast %28 : vector<1x128xi32> to vector<5x128xi32>
    %39 = arith.cmpi eq, %4, %38 : vector<5x128xi32>
    %cst_15 = arith.constant dense<0xFF800000> : vector<128xf32>
    %40 = vector.multi_reduction <maximumf>, %37, %cst_15 [0] : vector<5x128xf32> to vector<128xf32>
    %41 = vector.shape_cast %40 : vector<128xf32> to vector<1x128xf32>
    %42 = vector.broadcast %41 : vector<1x128xf32> to vector<5x128xf32>
    %43 = arith.subf %37, %42 : vector<5x128xf32>
    %44 = math.exp %43 : vector<5x128xf32>
    %cst_16 = arith.constant dense<0.000000e+00> : vector<128xf32>
    %45 = vector.multi_reduction <add>, %44, %cst_16 [0] : vector<5x128xf32> to vector<128xf32>
    %46 = vector.shape_cast %45 : vector<128xf32> to vector<1x128xf32>
    %47 = math.log %46 : vector<1x128xf32>
    %48 = arith.addf %41, %47 : vector<1x128xf32>
    %cst_17 = arith.constant 0.000000e+00 : f32
    %49 = vector.broadcast %cst_17 : f32 to vector<5x128xf32>
    %50 = arith.select %39, %37, %49 : vector<5x128xi1>, vector<5x128xf32>
    %cst_18 = arith.constant dense<0.000000e+00> : vector<128xf32>
    %51 = vector.multi_reduction <add>, %50, %cst_18 [0] : vector<5x128xf32> to vector<128xf32>
    %52 = vector.shape_cast %51 : vector<128xf32> to vector<1x128xf32>
    %53 = arith.subf %48, %52 : vector<1x128xf32>
    %54 = arith.mulf %35, %53 : vector<1x128xf32>
    %55 = vector.shape_cast %54 : vector<1x128xf32> to vector<1x1x128xf32>
    %cst_19 = arith.constant dense<0.000000e+00> : vector<1xf32>
    %56 = vector.multi_reduction <add>, %55, %cst_19 [1, 2] : vector<1x1x128xf32> to vector<1xf32>
    %57 = vector.shape_cast %56 : vector<1xf32> to vector<1x1x1xf32>
    %58 = vector.extract %57[0, 0, 0] : f32 from vector<1x1x1xf32>
    %59 = vector.shape_cast %35 : vector<1x128xf32> to vector<1x1x128xf32>
    %cst_20 = arith.constant dense<0.000000e+00> : vector<1xf32>
    %60 = vector.multi_reduction <add>, %59, %cst_20 [1, 2] : vector<1x1x128xf32> to vector<1xf32>
    %61 = vector.shape_cast %60 : vector<1xf32> to vector<1x1x1xf32>
    %62 = vector.extract %61[0, 0, 0] : f32 from vector<1x1x1xf32>
    %cst_21 = arith.constant 9.99999996E-13 : f32
    %63 = arith.maximumf %62, %cst_21 : f32
    %64 = arith.divf %58, %63 : f32
    %65 = vector.broadcast %41 : vector<1x128xf32> to vector<5x128xf32>
    %66 = arith.cmpf oeq, %37, %65 : vector<5x128xf32>
    %c5_i32 = arith.constant 5 : i32
    %67 = vector.broadcast %c5_i32 : i32 to vector<5x128xi32>
    %68 = arith.select %66, %4, %67 : vector<5x128xi1>, vector<5x128xi32>
    %cst_22 = arith.constant dense<2147483647> : vector<128xi32>
    %69 = vector.multi_reduction <minsi>, %68, %cst_22 [0] : vector<5x128xi32> to vector<128xi32>
    %70 = vector.shape_cast %69 : vector<128xi32> to vector<1x128xi32>
    %c0_23 = arith.constant 0 : index
    %c0_24 = arith.constant 0 : index
    %c0_25 = arith.constant 0 : index
    %71 = vector.load %arg9[%c0_23, %c0_24, %c0_25] : memref<2x1x128xi32, #tpu.memory_space<vmem>>, vector<1x1x128xi32>
    %72 = vector.shape_cast %71 : vector<1x1x128xi32> to vector<1x128xi32>
    %73 = vector.shape_cast %70 : vector<1x128xi32> to vector<1x1x128xi32>
    tpu.vector_store %arg9[%c0_23, %c0_24, %c0_25], %73 {strides = array<i32>} : memref<2x1x128xi32, #tpu.memory_space<vmem>>, vector<1x1x128xi32>,
    %c0_i32_26 = arith.constant 0 : i32
    %74 = vector.broadcast %c0_i32_26 : i32 to vector<8x1xi32>
    %75 = arith.cmpi sge, %10, %74 : vector<8x1xi32>
    %c0_i32_27 = arith.constant 0 : i32
    %76 = vector.shape_cast %70 : vector<1x128xi32> to vector<1x128xi32>
    %77 = vector.broadcast %76 : vector<1x128xi32> to vector<8x128xi32>
    %78 = vector.broadcast %c0_i32_27 : i32 to vector<8x128xi32>
    %79 = arith.select %13, %77, %78 : vector<8x128xi1>, vector<8x128xi32>
    %cst_28 = arith.constant dense<0> : vector<8xi32>
    %80 = vector.multi_reduction <add>, %79, %cst_28 [1] : vector<8x128xi32> to vector<8xi32>
    %81 = vector.shape_cast %80 : vector<8xi32> to vector<8x1xi32>
    %82 = arith.cmpi eq, %81, %11 : vector<8x1xi32>
    %83 = arith.andi %75, %82 : vector<8x1xi1>
    %cst_29 = arith.constant 1.000000e+00 : f32
    %cst_30 = arith.constant 0.000000e+00 : f32
    %84 = vector.broadcast %cst_29 : f32 to vector<8x1xf32>
    %85 = vector.broadcast %cst_30 : f32 to vector<8x1xf32>
    %86 = arith.select %83, %84, %85 : vector<8x1xi1>, vector<8x1xf32>
    %87 = vector.shape_cast %86 : vector<8x1xf32> to vector<1x8x1xf32>
    %cst_31 = arith.constant dense<0.000000e+00> : vector<1xf32>
    %88 = vector.multi_reduction <add>, %87, %cst_31 [1, 2] : vector<1x8x1xf32> to vector<1xf32>
    %89 = vector.shape_cast %88 : vector<1xf32> to vector<1x1x1xf32>
    %90 = vector.extract %89[0, 0, 0] : f32 from vector<1x1x1xf32>
    %cst_32 = arith.constant 1.000000e+00 : f32
    %cst_33 = arith.constant 0.000000e+00 : f32
    %91 = vector.broadcast %cst_32 : f32 to vector<8x1xf32>
    %92 = vector.broadcast %cst_33 : f32 to vector<8x1xf32>
    %93 = arith.select %75, %91, %92 : vector<8x1xi1>, vector<8x1xf32>
    %94 = vector.shape_cast %93 : vector<8x1xf32> to vector<1x8x1xf32>
    %cst_34 = arith.constant dense<0.000000e+00> : vector<1xf32>
    %95 = vector.multi_reduction <add>, %94, %cst_34 [1, 2] : vector<1x8x1xf32> to vector<1xf32>
    %96 = vector.shape_cast %95 : vector<1xf32> to vector<1x1x1xf32>
    %97 = vector.extract %96[0, 0, 0] : f32 from vector<1x1x1xf32>
    %cst_35 = arith.constant 0.000000e+00 : f32
    %98 = arith.cmpf ogt, %97, %cst_35 : f32
    %cst_36 = arith.constant 1.000000e+02 : f32
    %99 = arith.mulf %cst_36, %90 : f32
    %cst_37 = arith.constant 1.000000e+00 : f32
    %100 = arith.maximumf %97, %cst_37 : f32
    %101 = arith.divf %99, %100 : f32
    %cst_38 = arith.constant 1.000000e+02 : f32
    %102 = arith.select %98, %101, %cst_38 : f32
    %c0_39 = arith.constant 0 : index
    %c0_40 = arith.constant 0 : index
    %c0_41 = arith.constant 0 : index
    %103 = vector.load %arg6[%c0_39, %c0_40, %c0_41] : memref<2x1x128xi32, #tpu.memory_space<vmem>>, vector<1x1x128xi32>
    %104 = vector.shape_cast %103 : vector<1x1x128xi32> to vector<1x128xi32>
    %c4_i32_42 = arith.constant 4 : i32
    %105 = vector.broadcast %c4_i32_42 : i32 to vector<1x128xi32>
    %106 = arith.cmpi ne, %70, %105 : vector<1x128xi32>
    %107 = arith.andi %2, %106 : vector<1x128xi1>
    %cst_43 = arith.constant 1.000000e+00 : f32
    %cst_44 = arith.constant 0.000000e+00 : f32
    %108 = vector.broadcast %cst_43 : f32 to vector<1x128xf32>
    %109 = vector.broadcast %cst_44 : f32 to vector<1x128xf32>
    %110 = arith.select %107, %108, %109 : vector<1x128xi1>, vector<1x128xf32>
    %111 = vector.broadcast %104 : vector<1x128xi32> to vector<2x128xi32>
    %112 = arith.cmpi eq, %6, %111 : vector<2x128xi32>
    %cst_45 = arith.constant 0.000000e+00 : f32
    %113 = vector.shape_cast %110 : vector<1x128xf32> to vector<1x128xf32>
    %114 = vector.broadcast %113 : vector<1x128xf32> to vector<2x128xf32>
    %115 = vector.broadcast %cst_45 : f32 to vector<2x128xf32>
    %116 = arith.select %112, %114, %115 : vector<2x128xi1>, vector<2x128xf32>
    %cst_46 = arith.constant dense<0.000000e+00> : vector<2xf32>
    %117 = vector.multi_reduction <add>, %116, %cst_46 [1] : vector<2x128xf32> to vector<2xf32>
    %118 = vector.shape_cast %117 : vector<2xf32> to vector<2x1xf32>
    %119 = arith.subf %118, %9 : vector<2x1xf32>
    %120 = math.absf %119 : vector<2x1xf32>
    %121 = vector.shape_cast %120 : vector<2x1xf32> to vector<1x2x1xf32>
    %cst_47 = arith.constant dense<0.000000e+00> : vector<1xf32>
    %122 = vector.multi_reduction <add>, %121, %cst_47 [1, 2] : vector<1x2x1xf32> to vector<1xf32>
    %123 = vector.shape_cast %122 : vector<1xf32> to vector<1x1x1xf32>
    %124 = vector.extract %123[0, 0, 0] : f32 from vector<1x1x1xf32>
    %cst_48 = arith.constant 2.000000e+00 : f32
    %125 = arith.divf %124, %cst_48 : f32
    %c0_49 = arith.constant 0 : index
    %c0_50 = arith.constant 0 : index
    %c0_51 = arith.constant 0 : index
    %126 = vector.load %arg3[%c0_49, %c0_50, %c0_51] : memref<2x1x8xf32, #tpu.memory_space<vmem>>, vector<1x1x8xf32>
    %127 = vector.shape_cast %126 : vector<1x1x8xf32> to vector<1x8xf32>
    %c0_52 = arith.constant 0 : index
    %c0_53 = arith.constant 0 : index
    %c0_54 = arith.constant 0 : index
    %128 = vector.load %arg4[%c0_52, %c0_53, %c0_54] : memref<2x4x8xf32, #tpu.memory_space<vmem>>, vector<1x4x8xf32>
    %129 = vector.shape_cast %128 : vector<1x4x8xf32> to vector<4x8xf32>
    %c0_55 = arith.constant 0 : index
    %c0_56 = arith.constant 0 : index
    %c0_57 = arith.constant 0 : index
    %130 = vector.load %arg5[%c0_55, %c0_56, %c0_57] : memref<2x4x8xf32, #tpu.memory_space<vmem>>, vector<1x4x8xf32>
    %131 = vector.shape_cast %130 : vector<1x4x8xf32> to vector<4x8xf32>
    %132 = arith.subf %129, %131 : vector<4x8xf32>
    %133 = math.absf %132 : vector<4x8xf32>
    %134 = vector.broadcast %127 : vector<1x8xf32> to vector<4x8xf32>
    %135 = arith.mulf %133, %134 : vector<4x8xf32>
    %136 = vector.shape_cast %135 : vector<4x8xf32> to vector<1x4x8xf32>
    %cst_58 = arith.constant dense<0.000000e+00> : vector<1xf32>
    %137 = vector.multi_reduction <add>, %136, %cst_58 [1, 2] : vector<1x4x8xf32> to vector<1xf32>
    %138 = vector.shape_cast %137 : vector<1xf32> to vector<1x1x1xf32>
    %139 = vector.extract %138[0, 0, 0] : f32 from vector<1x1x1xf32>
    %140 = vector.extract_strided_slice %129 {offsets = [0, 0], sizes = [2, 8], strides = [1, 1]} : vector<4x8xf32> to vector<2x8xf32>
    %141 = vector.extract_strided_slice %129 {offsets = [2, 0], sizes = [2, 8], strides = [1, 1]} : vector<4x8xf32> to vector<2x8xf32>
    %cst_59 = arith.constant 5.000000e-01 : f32
    %142 = vector.broadcast %cst_59 : f32 to vector<2x8xf32>
    %143 = arith.mulf %142, %141 : vector<2x8xf32>
    %144 = arith.subf %140, %143 : vector<2x8xf32>
    %145 = vector.extract_strided_slice %129 {offsets = [0, 0], sizes = [2, 8], strides = [1, 1]} : vector<4x8xf32> to vector<2x8xf32>
    %146 = vector.extract_strided_slice %129 {offsets = [2, 0], sizes = [2, 8], strides = [1, 1]} : vector<4x8xf32> to vector<2x8xf32>
    %cst_60 = arith.constant 5.000000e-01 : f32
    %147 = vector.broadcast %cst_60 : f32 to vector<2x8xf32>
    %148 = arith.mulf %147, %146 : vector<2x8xf32>
    %149 = arith.addf %145, %148 : vector<2x8xf32>
    %150 = vector.extract_strided_slice %131 {offsets = [0, 0], sizes = [2, 8], strides = [1, 1]} : vector<4x8xf32> to vector<2x8xf32>
    %151 = vector.extract_strided_slice %131 {offsets = [2, 0], sizes = [2, 8], strides = [1, 1]} : vector<4x8xf32> to vector<2x8xf32>
    %cst_61 = arith.constant 5.000000e-01 : f32
    %152 = vector.broadcast %cst_61 : f32 to vector<2x8xf32>
    %153 = arith.mulf %152, %151 : vector<2x8xf32>
    %154 = arith.subf %150, %153 : vector<2x8xf32>
    %155 = vector.extract_strided_slice %131 {offsets = [0, 0], sizes = [2, 8], strides = [1, 1]} : vector<4x8xf32> to vector<2x8xf32>
    %156 = vector.extract_strided_slice %131 {offsets = [2, 0], sizes = [2, 8], strides = [1, 1]} : vector<4x8xf32> to vector<2x8xf32>
    %cst_62 = arith.constant 5.000000e-01 : f32
    %157 = vector.broadcast %cst_62 : f32 to vector<2x8xf32>
    %158 = arith.mulf %157, %156 : vector<2x8xf32>
    %159 = arith.addf %155, %158 : vector<2x8xf32>
    %160 = arith.subf %149, %144 : vector<2x8xf32>
    %161 = arith.subf %159, %154 : vector<2x8xf32>
    %162 = vector.extract_strided_slice %160 {offsets = [0, 0], sizes = [1, 8], strides = [1, 1]} : vector<2x8xf32> to vector<1x8xf32>
    %163 = vector.extract_strided_slice %160 {offsets = [1, 0], sizes = [1, 8], strides = [1, 1]} : vector<2x8xf32> to vector<1x8xf32>
    %164 = arith.mulf %162, %163 : vector<1x8xf32>
    %165 = vector.extract_strided_slice %161 {offsets = [0, 0], sizes = [1, 8], strides = [1, 1]} : vector<2x8xf32> to vector<1x8xf32>
    %166 = vector.extract_strided_slice %161 {offsets = [1, 0], sizes = [1, 8], strides = [1, 1]} : vector<2x8xf32> to vector<1x8xf32>
    %167 = arith.mulf %165, %166 : vector<1x8xf32>
    %168 = arith.minimumf %149, %159 : vector<2x8xf32>
    %169 = arith.maximumf %144, %154 : vector<2x8xf32>
    %170 = arith.subf %168, %169 : vector<2x8xf32>
    %cst_63 = arith.constant 0.000000e+00 : f32
    %171 = vector.broadcast %cst_63 : f32 to vector<2x8xf32>
    %172 = arith.maximumf %170, %171 : vector<2x8xf32>
    %173 = vector.extract_strided_slice %172 {offsets = [0, 0], sizes = [1, 8], strides = [1, 1]} : vector<2x8xf32> to vector<1x8xf32>
    %174 = vector.extract_strided_slice %172 {offsets = [1, 0], sizes = [1, 8], strides = [1, 1]} : vector<2x8xf32> to vector<1x8xf32>
    %175 = arith.mulf %173, %174 : vector<1x8xf32>
    %176 = arith.addf %164, %167 : vector<1x8xf32>
    %177 = arith.subf %176, %175 : vector<1x8xf32>
    %cst_64 = arith.constant 1.000000e-07 : f32
    %178 = vector.broadcast %cst_64 : f32 to vector<1x8xf32>
    %179 = arith.maximumf %177, %178 : vector<1x8xf32>
    %180 = arith.divf %175, %179 : vector<1x8xf32>
    %181 = arith.maximumf %149, %159 : vector<2x8xf32>
    %182 = arith.minimumf %144, %154 : vector<2x8xf32>
    %183 = arith.subf %181, %182 : vector<2x8xf32>
    %184 = vector.extract_strided_slice %183 {offsets = [0, 0], sizes = [1, 8], strides = [1, 1]} : vector<2x8xf32> to vector<1x8xf32>
    %185 = vector.extract_strided_slice %183 {offsets = [1, 0], sizes = [1, 8], strides = [1, 1]} : vector<2x8xf32> to vector<1x8xf32>
    %186 = arith.mulf %184, %185 : vector<1x8xf32>
    %187 = arith.subf %186, %177 : vector<1x8xf32>
    %cst_65 = arith.constant 1.000000e-07 : f32
    %188 = vector.broadcast %cst_65 : f32 to vector<1x8xf32>
    %189 = arith.maximumf %186, %188 : vector<1x8xf32>
    %190 = arith.divf %187, %189 : vector<1x8xf32>
    %191 = arith.subf %180, %190 : vector<1x8xf32>
    %cst_66 = arith.constant 1.000000e+00 : f32
    %192 = vector.broadcast %cst_66 : f32 to vector<1x8xf32>
    %193 = arith.subf %192, %191 : vector<1x8xf32>
    %194 = arith.mulf %193, %127 : vector<1x8xf32>
    %195 = vector.shape_cast %194 : vector<1x8xf32> to vector<1x1x8xf32>
    %cst_67 = arith.constant dense<0.000000e+00> : vector<1xf32>
    %196 = vector.multi_reduction <add>, %195, %cst_67 [1, 2] : vector<1x1x8xf32> to vector<1xf32>
    %197 = vector.shape_cast %196 : vector<1xf32> to vector<1x1x1xf32>
    %198 = vector.extract %197[0, 0, 0] : f32 from vector<1x1x1xf32>
    %c0_i32_68 = arith.constant 0 : i32
    %199 = vector.broadcast %c0_i32_68 : i32 to vector<1x128xi32>
    %200 = arith.cmpi eq, %5, %199 : vector<1x128xi32>
    %cst_69 = arith.constant 0.000000e+00 : f32
    %201 = vector.broadcast %64 : f32 to vector<1x128xf32>
    %202 = vector.broadcast %cst_69 : f32 to vector<1x128xf32>
    %203 = arith.select %200, %201, %202 : vector<1x128xi1>, vector<1x128xf32>
    %c1_i32_70 = arith.constant 1 : i32
    %204 = vector.broadcast %c1_i32_70 : i32 to vector<1x128xi32>
    %205 = arith.cmpi eq, %5, %204 : vector<1x128xi32>
    %206 = vector.broadcast %139 : f32 to vector<1x128xf32>
    %207 = arith.select %205, %206, %203 : vector<1x128xi1>, vector<1x128xf32>
    %c2_i32 = arith.constant 2 : i32
    %208 = vector.broadcast %c2_i32 : i32 to vector<1x128xi32>
    %209 = arith.cmpi eq, %5, %208 : vector<1x128xi32>
    %210 = vector.broadcast %198 : f32 to vector<1x128xf32>
    %211 = arith.select %209, %210, %207 : vector<1x128xi1>, vector<1x128xf32>
    %c3_i32 = arith.constant 3 : i32
    %212 = vector.broadcast %c3_i32 : i32 to vector<1x128xi32>
    %213 = arith.cmpi eq, %5, %212 : vector<1x128xi32>
    %214 = vector.broadcast %102 : f32 to vector<1x128xf32>
    %215 = arith.select %213, %214, %211 : vector<1x128xi1>, vector<1x128xf32>
    %c4_i32_71 = arith.constant 4 : i32
    %216 = vector.broadcast %c4_i32_71 : i32 to vector<1x128xi32>
    %217 = arith.cmpi eq, %5, %216 : vector<1x128xi32>
    %218 = vector.broadcast %125 : f32 to vector<1x128xf32>
    %219 = arith.select %217, %218, %215 : vector<1x128xi1>, vector<1x128xf32>
    %c5_i32_72 = arith.constant 5 : i32
    %220 = vector.broadcast %c5_i32_72 : i32 to vector<1x128xi32>
    %221 = arith.cmpi eq, %5, %220 : vector<1x128xi32>
    %222 = vector.broadcast %62 : f32 to vector<1x128xf32>
    %223 = arith.select %221, %222, %219 : vector<1x128xi1>, vector<1x128xf32>
    %c0_73 = arith.constant 0 : index
    %c0_74 = arith.constant 0 : index
    %c0_75 = arith.constant 0 : index
    %224 = vector.load %arg8[%c0_73, %c0_74, %c0_75] : memref<2x1x128xf32, #tpu.memory_space<vmem>>, vector<1x1x128xf32>
    %225 = vector.shape_cast %224 : vector<1x1x128xf32> to vector<1x128xf32>
    %226 = vector.shape_cast %223 : vector<1x128xf32> to vector<1x1x128xf32>
    tpu.vector_store %arg8[%c0_73, %c0_74, %c0_75], %226 {strides = array<i32>} : memref<2x1x128xf32, #tpu.memory_space<vmem>>, vector<1x1x128xf32>,
    %227 = vector.extract_strided_slice %7 {offsets = [0, 1], sizes = [8, 1], strides = [1, 1]} : vector<8x2xi32> to vector<8x1xi32>
    %228 = vector.extract_strided_slice %8 {offsets = [0, 1], sizes = [8, 1], strides = [1, 1]} : vector<8x2xi32> to vector<8x1xi32>
    %229 = vector.broadcast %227 : vector<8x1xi32> to vector<8x128xi32>
    %230 = arith.cmpi eq, %3, %229 : vector<8x128xi32>
    %c0_i32_76 = arith.constant 0 : i32
    %231 = vector.shape_cast %228 : vector<8x1xi32> to vector<8x1xi32>
    %232 = vector.broadcast %231 : vector<8x1xi32> to vector<8x128xi32>
    %233 = vector.broadcast %c0_i32_76 : i32 to vector<8x128xi32>
    %234 = arith.select %230, %232, %233 : vector<8x128xi1>, vector<8x128xi32>
    %cst_77 = arith.constant dense<0> : vector<128xi32>
    %235 = vector.multi_reduction <add>, %234, %cst_77 [0] : vector<8x128xi32> to vector<128xi32>
    %236 = vector.shape_cast %235 : vector<128xi32> to vector<1x128xi32>
    %c1_i32_78 = arith.constant 1 : i32
    %c0_i32_79 = arith.constant 0 : i32
    %237 = vector.broadcast %c1_i32_78 : i32 to vector<8x128xi32>
    %238 = vector.broadcast %c0_i32_79 : i32 to vector<8x128xi32>
    %239 = arith.select %230, %237, %238 : vector<8x128xi1>, vector<8x128xi32>
    %cst_80 = arith.constant dense<0> : vector<128xi32>
    %240 = vector.multi_reduction <add>, %239, %cst_80 [0] : vector<8x128xi32> to vector<128xi32>
    %241 = vector.shape_cast %240 : vector<128xi32> to vector<1x128xi32>
    %c0_i32_81 = arith.constant 0 : i32
    %242 = vector.broadcast %c0_i32_81 : i32 to vector<1x128xi32>
    %243 = arith.cmpi sgt, %241, %242 : vector<1x128xi32>
    %c4_i32_82 = arith.constant 4 : i32
    %244 = vector.broadcast %c4_i32_82 : i32 to vector<1x128xi32>
    %245 = arith.select %243, %236, %244 : vector<1x128xi1>, vector<1x128xi32>
    %c4_i32_83 = arith.constant 4 : i32
    %246 = vector.broadcast %c4_i32_83 : i32 to vector<1x128xi32>
    %247 = arith.cmpi eq, %245, %246 : vector<1x128xi32>
    %cst_84 = arith.constant 1.000000e-01 : f32
    %cst_85 = arith.constant 1.000000e+00 : f32
    %248 = vector.broadcast %cst_84 : f32 to vector<1x128xf32>
    %249 = vector.broadcast %cst_85 : f32 to vector<1x128xf32>
    %250 = arith.select %247, %248, %249 : vector<1x128xi1>, vector<1x128xf32>
    %cst_86 = arith.constant 0.000000e+00 : f32
    %251 = vector.broadcast %cst_86 : f32 to vector<1x128xf32>
    %252 = arith.select %2, %250, %251 : vector<1x128xi1>, vector<1x128xf32>
    %c1 = arith.constant 1 : index
    %c0_87 = arith.constant 0 : index
    %c0_88 = arith.constant 0 : index
    %253 = vector.load %arg0[%c1, %c0_87, %c0_88] : memref<2x5x128xf32, #tpu.memory_space<vmem>>, vector<1x5x128xf32>
    %254 = vector.shape_cast %253 : vector<1x5x128xf32> to vector<5x128xf32>
    %255 = vector.broadcast %245 : vector<1x128xi32> to vector<5x128xi32>
    %256 = arith.cmpi eq, %4, %255 : vector<5x128xi32>
    %cst_89 = arith.constant dense<0xFF800000> : vector<128xf32>
    %257 = vector.multi_reduction <maximumf>, %254, %cst_89 [0] : vector<5x128xf32> to vector<128xf32>
    %258 = vector.shape_cast %257 : vector<128xf32> to vector<1x128xf32>
    %259 = vector.broadcast %258 : vector<1x128xf32> to vector<5x128xf32>
    %260 = arith.subf %254, %259 : vector<5x128xf32>
    %261 = math.exp %260 : vector<5x128xf32>
    %cst_90 = arith.constant dense<0.000000e+00> : vector<128xf32>
    %262 = vector.multi_reduction <add>, %261, %cst_90 [0] : vector<5x128xf32> to vector<128xf32>
    %263 = vector.shape_cast %262 : vector<128xf32> to vector<1x128xf32>
    %264 = math.log %263 : vector<1x128xf32>
    %265 = arith.addf %258, %264 : vector<1x128xf32>
    %cst_91 = arith.constant 0.000000e+00 : f32
    %266 = vector.broadcast %cst_91 : f32 to vector<5x128xf32>
    %267 = arith.select %256, %254, %266 : vector<5x128xi1>, vector<5x128xf32>
    %cst_92 = arith.constant dense<0.000000e+00> : vector<128xf32>
    %268 = vector.multi_reduction <add>, %267, %cst_92 [0] : vector<5x128xf32> to vector<128xf32>
    %269 = vector.shape_cast %268 : vector<128xf32> to vector<1x128xf32>
    %270 = arith.subf %265, %269 : vector<1x128xf32>
    %271 = arith.mulf %252, %270 : vector<1x128xf32>
    %272 = vector.shape_cast %271 : vector<1x128xf32> to vector<1x1x128xf32>
    %cst_93 = arith.constant dense<0.000000e+00> : vector<1xf32>
    %273 = vector.multi_reduction <add>, %272, %cst_93 [1, 2] : vector<1x1x128xf32> to vector<1xf32>
    %274 = vector.shape_cast %273 : vector<1xf32> to vector<1x1x1xf32>
    %275 = vector.extract %274[0, 0, 0] : f32 from vector<1x1x1xf32>
    %276 = vector.shape_cast %252 : vector<1x128xf32> to vector<1x1x128xf32>
    %cst_94 = arith.constant dense<0.000000e+00> : vector<1xf32>
    %277 = vector.multi_reduction <add>, %276, %cst_94 [1, 2] : vector<1x1x128xf32> to vector<1xf32>
    %278 = vector.shape_cast %277 : vector<1xf32> to vector<1x1x1xf32>
    %279 = vector.extract %278[0, 0, 0] : f32 from vector<1x1x1xf32>
    %cst_95 = arith.constant 9.99999996E-13 : f32
    %280 = arith.maximumf %279, %cst_95 : f32
    %281 = arith.divf %275, %280 : f32
    %282 = vector.broadcast %258 : vector<1x128xf32> to vector<5x128xf32>
    %283 = arith.cmpf oeq, %254, %282 : vector<5x128xf32>
    %c5_i32_96 = arith.constant 5 : i32
    %284 = vector.broadcast %c5_i32_96 : i32 to vector<5x128xi32>
    %285 = arith.select %283, %4, %284 : vector<5x128xi1>, vector<5x128xi32>
    %cst_97 = arith.constant dense<2147483647> : vector<128xi32>
    %286 = vector.multi_reduction <minsi>, %285, %cst_97 [0] : vector<5x128xi32> to vector<128xi32>
    %287 = vector.shape_cast %286 : vector<128xi32> to vector<1x128xi32>
    %c1_98 = arith.constant 1 : index
    %c0_99 = arith.constant 0 : index
    %c0_100 = arith.constant 0 : index
    %288 = vector.load %arg9[%c1_98, %c0_99, %c0_100] : memref<2x1x128xi32, #tpu.memory_space<vmem>>, vector<1x1x128xi32>
    %289 = vector.shape_cast %288 : vector<1x1x128xi32> to vector<1x128xi32>
    %290 = vector.shape_cast %287 : vector<1x128xi32> to vector<1x1x128xi32>
    tpu.vector_store %arg9[%c1_98, %c0_99, %c0_100], %290 {strides = array<i32>} : memref<2x1x128xi32, #tpu.memory_space<vmem>>, vector<1x1x128xi32>,
    %c0_i32_101 = arith.constant 0 : i32
    %291 = vector.broadcast %c0_i32_101 : i32 to vector<8x1xi32>
    %292 = arith.cmpi sge, %227, %291 : vector<8x1xi32>
    %c0_i32_102 = arith.constant 0 : i32
    %293 = vector.shape_cast %287 : vector<1x128xi32> to vector<1x128xi32>
    %294 = vector.broadcast %293 : vector<1x128xi32> to vector<8x128xi32>
    %295 = vector.broadcast %c0_i32_102 : i32 to vector<8x128xi32>
    %296 = arith.select %230, %294, %295 : vector<8x128xi1>, vector<8x128xi32>
    %cst_103 = arith.constant dense<0> : vector<8xi32>
    %297 = vector.multi_reduction <add>, %296, %cst_103 [1] : vector<8x128xi32> to vector<8xi32>
    %298 = vector.shape_cast %297 : vector<8xi32> to vector<8x1xi32>
    %299 = arith.cmpi eq, %298, %228 : vector<8x1xi32>
    %300 = arith.andi %292, %299 : vector<8x1xi1>
    %cst_104 = arith.constant 1.000000e+00 : f32
    %cst_105 = arith.constant 0.000000e+00 : f32
    %301 = vector.broadcast %cst_104 : f32 to vector<8x1xf32>
    %302 = vector.broadcast %cst_105 : f32 to vector<8x1xf32>
    %303 = arith.select %300, %301, %302 : vector<8x1xi1>, vector<8x1xf32>
    %304 = vector.shape_cast %303 : vector<8x1xf32> to vector<1x8x1xf32>
    %cst_106 = arith.constant dense<0.000000e+00> : vector<1xf32>
    %305 = vector.multi_reduction <add>, %304, %cst_106 [1, 2] : vector<1x8x1xf32> to vector<1xf32>
    %306 = vector.shape_cast %305 : vector<1xf32> to vector<1x1x1xf32>
    %307 = vector.extract %306[0, 0, 0] : f32 from vector<1x1x1xf32>
    %cst_107 = arith.constant 1.000000e+00 : f32
    %cst_108 = arith.constant 0.000000e+00 : f32
    %308 = vector.broadcast %cst_107 : f32 to vector<8x1xf32>
    %309 = vector.broadcast %cst_108 : f32 to vector<8x1xf32>
    %310 = arith.select %292, %308, %309 : vector<8x1xi1>, vector<8x1xf32>
    %311 = vector.shape_cast %310 : vector<8x1xf32> to vector<1x8x1xf32>
    %cst_109 = arith.constant dense<0.000000e+00> : vector<1xf32>
    %312 = vector.multi_reduction <add>, %311, %cst_109 [1, 2] : vector<1x8x1xf32> to vector<1xf32>
    %313 = vector.shape_cast %312 : vector<1xf32> to vector<1x1x1xf32>
    %314 = vector.extract %313[0, 0, 0] : f32 from vector<1x1x1xf32>
    %cst_110 = arith.constant 0.000000e+00 : f32
    %315 = arith.cmpf ogt, %314, %cst_110 : f32
    %cst_111 = arith.constant 1.000000e+02 : f32
    %316 = arith.mulf %cst_111, %307 : f32
    %cst_112 = arith.constant 1.000000e+00 : f32
    %317 = arith.maximumf %314, %cst_112 : f32
    %318 = arith.divf %316, %317 : f32
    %cst_113 = arith.constant 1.000000e+02 : f32
    %319 = arith.select %315, %318, %cst_113 : f32
    %c1_114 = arith.constant 1 : index
    %c0_115 = arith.constant 0 : index
    %c0_116 = arith.constant 0 : index
    %320 = vector.load %arg6[%c1_114, %c0_115, %c0_116] : memref<2x1x128xi32, #tpu.memory_space<vmem>>, vector<1x1x128xi32>
    %321 = vector.shape_cast %320 : vector<1x1x128xi32> to vector<1x128xi32>
    %c4_i32_117 = arith.constant 4 : i32
    %322 = vector.broadcast %c4_i32_117 : i32 to vector<1x128xi32>
    %323 = arith.cmpi ne, %287, %322 : vector<1x128xi32>
    %324 = arith.andi %2, %323 : vector<1x128xi1>
    %cst_118 = arith.constant 1.000000e+00 : f32
    %cst_119 = arith.constant 0.000000e+00 : f32
    %325 = vector.broadcast %cst_118 : f32 to vector<1x128xf32>
    %326 = vector.broadcast %cst_119 : f32 to vector<1x128xf32>
    %327 = arith.select %324, %325, %326 : vector<1x128xi1>, vector<1x128xf32>
    %328 = vector.broadcast %321 : vector<1x128xi32> to vector<2x128xi32>
    %329 = arith.cmpi eq, %6, %328 : vector<2x128xi32>
    %cst_120 = arith.constant 0.000000e+00 : f32
    %330 = vector.shape_cast %327 : vector<1x128xf32> to vector<1x128xf32>
    %331 = vector.broadcast %330 : vector<1x128xf32> to vector<2x128xf32>
    %332 = vector.broadcast %cst_120 : f32 to vector<2x128xf32>
    %333 = arith.select %329, %331, %332 : vector<2x128xi1>, vector<2x128xf32>
    %cst_121 = arith.constant dense<0.000000e+00> : vector<2xf32>
    %334 = vector.multi_reduction <add>, %333, %cst_121 [1] : vector<2x128xf32> to vector<2xf32>
    %335 = vector.shape_cast %334 : vector<2xf32> to vector<2x1xf32>
    %336 = arith.subf %335, %9 : vector<2x1xf32>
    %337 = math.absf %336 : vector<2x1xf32>
    %338 = vector.shape_cast %337 : vector<2x1xf32> to vector<1x2x1xf32>
    %cst_122 = arith.constant dense<0.000000e+00> : vector<1xf32>
    %339 = vector.multi_reduction <add>, %338, %cst_122 [1, 2] : vector<1x2x1xf32> to vector<1xf32>
    %340 = vector.shape_cast %339 : vector<1xf32> to vector<1x1x1xf32>
    %341 = vector.extract %340[0, 0, 0] : f32 from vector<1x1x1xf32>
    %cst_123 = arith.constant 2.000000e+00 : f32
    %342 = arith.divf %341, %cst_123 : f32
    %c1_124 = arith.constant 1 : index
    %c0_125 = arith.constant 0 : index
    %c0_126 = arith.constant 0 : index
    %343 = vector.load %arg3[%c1_124, %c0_125, %c0_126] : memref<2x1x8xf32, #tpu.memory_space<vmem>>, vector<1x1x8xf32>
    %344 = vector.shape_cast %343 : vector<1x1x8xf32> to vector<1x8xf32>
    %c1_127 = arith.constant 1 : index
    %c0_128 = arith.constant 0 : index
    %c0_129 = arith.constant 0 : index
    %345 = vector.load %arg4[%c1_127, %c0_128, %c0_129] : memref<2x4x8xf32, #tpu.memory_space<vmem>>, vector<1x4x8xf32>
    %346 = vector.shape_cast %345 : vector<1x4x8xf32> to vector<4x8xf32>
    %c1_130 = arith.constant 1 : index
    %c0_131 = arith.constant 0 : index
    %c0_132 = arith.constant 0 : index
    %347 = vector.load %arg5[%c1_130, %c0_131, %c0_132] : memref<2x4x8xf32, #tpu.memory_space<vmem>>, vector<1x4x8xf32>
    %348 = vector.shape_cast %347 : vector<1x4x8xf32> to vector<4x8xf32>
    %349 = arith.subf %346, %348 : vector<4x8xf32>
    %350 = math.absf %349 : vector<4x8xf32>
    %351 = vector.broadcast %344 : vector<1x8xf32> to vector<4x8xf32>
    %352 = arith.mulf %350, %351 : vector<4x8xf32>
    %353 = vector.shape_cast %352 : vector<4x8xf32> to vector<1x4x8xf32>
    %cst_133 = arith.constant dense<0.000000e+00> : vector<1xf32>
    %354 = vector.multi_reduction <add>, %353, %cst_133 [1, 2] : vector<1x4x8xf32> to vector<1xf32>
    %355 = vector.shape_cast %354 : vector<1xf32> to vector<1x1x1xf32>
    %356 = vector.extract %355[0, 0, 0] : f32 from vector<1x1x1xf32>
    %357 = vector.extract_strided_slice %346 {offsets = [0, 0], sizes = [2, 8], strides = [1, 1]} : vector<4x8xf32> to vector<2x8xf32>
    %358 = vector.extract_strided_slice %346 {offsets = [2, 0], sizes = [2, 8], strides = [1, 1]} : vector<4x8xf32> to vector<2x8xf32>
    %cst_134 = arith.constant 5.000000e-01 : f32
    %359 = vector.broadcast %cst_134 : f32 to vector<2x8xf32>
    %360 = arith.mulf %359, %358 : vector<2x8xf32>
    %361 = arith.subf %357, %360 : vector<2x8xf32>
    %362 = vector.extract_strided_slice %346 {offsets = [0, 0], sizes = [2, 8], strides = [1, 1]} : vector<4x8xf32> to vector<2x8xf32>
    %363 = vector.extract_strided_slice %346 {offsets = [2, 0], sizes = [2, 8], strides = [1, 1]} : vector<4x8xf32> to vector<2x8xf32>
    %cst_135 = arith.constant 5.000000e-01 : f32
    %364 = vector.broadcast %cst_135 : f32 to vector<2x8xf32>
    %365 = arith.mulf %364, %363 : vector<2x8xf32>
    %366 = arith.addf %362, %365 : vector<2x8xf32>
    %367 = vector.extract_strided_slice %348 {offsets = [0, 0], sizes = [2, 8], strides = [1, 1]} : vector<4x8xf32> to vector<2x8xf32>
    %368 = vector.extract_strided_slice %348 {offsets = [2, 0], sizes = [2, 8], strides = [1, 1]} : vector<4x8xf32> to vector<2x8xf32>
    %cst_136 = arith.constant 5.000000e-01 : f32
    %369 = vector.broadcast %cst_136 : f32 to vector<2x8xf32>
    %370 = arith.mulf %369, %368 : vector<2x8xf32>
    %371 = arith.subf %367, %370 : vector<2x8xf32>
    %372 = vector.extract_strided_slice %348 {offsets = [0, 0], sizes = [2, 8], strides = [1, 1]} : vector<4x8xf32> to vector<2x8xf32>
    %373 = vector.extract_strided_slice %348 {offsets = [2, 0], sizes = [2, 8], strides = [1, 1]} : vector<4x8xf32> to vector<2x8xf32>
    %cst_137 = arith.constant 5.000000e-01 : f32
    %374 = vector.broadcast %cst_137 : f32 to vector<2x8xf32>
    %375 = arith.mulf %374, %373 : vector<2x8xf32>
    %376 = arith.addf %372, %375 : vector<2x8xf32>
    %377 = arith.subf %366, %361 : vector<2x8xf32>
    %378 = arith.subf %376, %371 : vector<2x8xf32>
    %379 = vector.extract_strided_slice %377 {offsets = [0, 0], sizes = [1, 8], strides = [1, 1]} : vector<2x8xf32> to vector<1x8xf32>
    %380 = vector.extract_strided_slice %377 {offsets = [1, 0], sizes = [1, 8], strides = [1, 1]} : vector<2x8xf32> to vector<1x8xf32>
    %381 = arith.mulf %379, %380 : vector<1x8xf32>
    %382 = vector.extract_strided_slice %378 {offsets = [0, 0], sizes = [1, 8], strides = [1, 1]} : vector<2x8xf32> to vector<1x8xf32>
    %383 = vector.extract_strided_slice %378 {offsets = [1, 0], sizes = [1, 8], strides = [1, 1]} : vector<2x8xf32> to vector<1x8xf32>
    %384 = arith.mulf %382, %383 : vector<1x8xf32>
    %385 = arith.minimumf %366, %376 : vector<2x8xf32>
    %386 = arith.maximumf %361, %371 : vector<2x8xf32>
    %387 = arith.subf %385, %386 : vector<2x8xf32>
    %cst_138 = arith.constant 0.000000e+00 : f32
    %388 = vector.broadcast %cst_138 : f32 to vector<2x8xf32>
    %389 = arith.maximumf %387, %388 : vector<2x8xf32>
    %390 = vector.extract_strided_slice %389 {offsets = [0, 0], sizes = [1, 8], strides = [1, 1]} : vector<2x8xf32> to vector<1x8xf32>
    %391 = vector.extract_strided_slice %389 {offsets = [1, 0], sizes = [1, 8], strides = [1, 1]} : vector<2x8xf32> to vector<1x8xf32>
    %392 = arith.mulf %390, %391 : vector<1x8xf32>
    %393 = arith.addf %381, %384 : vector<1x8xf32>
    %394 = arith.subf %393, %392 : vector<1x8xf32>
    %cst_139 = arith.constant 1.000000e-07 : f32
    %395 = vector.broadcast %cst_139 : f32 to vector<1x8xf32>
    %396 = arith.maximumf %394, %395 : vector<1x8xf32>
    %397 = arith.divf %392, %396 : vector<1x8xf32>
    %398 = arith.maximumf %366, %376 : vector<2x8xf32>
    %399 = arith.minimumf %361, %371 : vector<2x8xf32>
    %400 = arith.subf %398, %399 : vector<2x8xf32>
    %401 = vector.extract_strided_slice %400 {offsets = [0, 0], sizes = [1, 8], strides = [1, 1]} : vector<2x8xf32> to vector<1x8xf32>
    %402 = vector.extract_strided_slice %400 {offsets = [1, 0], sizes = [1, 8], strides = [1, 1]} : vector<2x8xf32> to vector<1x8xf32>
    %403 = arith.mulf %401, %402 : vector<1x8xf32>
    %404 = arith.subf %403, %394 : vector<1x8xf32>
    %cst_140 = arith.constant 1.000000e-07 : f32
    %405 = vector.broadcast %cst_140 : f32 to vector<1x8xf32>
    %406 = arith.maximumf %403, %405 : vector<1x8xf32>
    %407 = arith.divf %404, %406 : vector<1x8xf32>
    %408 = arith.subf %397, %407 : vector<1x8xf32>
    %cst_141 = arith.constant 1.000000e+00 : f32
    %409 = vector.broadcast %cst_141 : f32 to vector<1x8xf32>
    %410 = arith.subf %409, %408 : vector<1x8xf32>
    %411 = arith.mulf %410, %344 : vector<1x8xf32>
    %412 = vector.shape_cast %411 : vector<1x8xf32> to vector<1x1x8xf32>
    %cst_142 = arith.constant dense<0.000000e+00> : vector<1xf32>
    %413 = vector.multi_reduction <add>, %412, %cst_142 [1, 2] : vector<1x1x8xf32> to vector<1xf32>
    %414 = vector.shape_cast %413 : vector<1xf32> to vector<1x1x1xf32>
    %415 = vector.extract %414[0, 0, 0] : f32 from vector<1x1x1xf32>
    %c0_i32_143 = arith.constant 0 : i32
    %416 = vector.broadcast %c0_i32_143 : i32 to vector<1x128xi32>
    %417 = arith.cmpi eq, %5, %416 : vector<1x128xi32>
    %cst_144 = arith.constant 0.000000e+00 : f32
    %418 = vector.broadcast %281 : f32 to vector<1x128xf32>
    %419 = vector.broadcast %cst_144 : f32 to vector<1x128xf32>
    %420 = arith.select %417, %418, %419 : vector<1x128xi1>, vector<1x128xf32>
    %c1_i32_145 = arith.constant 1 : i32
    %421 = vector.broadcast %c1_i32_145 : i32 to vector<1x128xi32>
    %422 = arith.cmpi eq, %5, %421 : vector<1x128xi32>
    %423 = vector.broadcast %356 : f32 to vector<1x128xf32>
    %424 = arith.select %422, %423, %420 : vector<1x128xi1>, vector<1x128xf32>
    %c2_i32_146 = arith.constant 2 : i32
    %425 = vector.broadcast %c2_i32_146 : i32 to vector<1x128xi32>
    %426 = arith.cmpi eq, %5, %425 : vector<1x128xi32>
    %427 = vector.broadcast %415 : f32 to vector<1x128xf32>
    %428 = arith.select %426, %427, %424 : vector<1x128xi1>, vector<1x128xf32>
    %c3_i32_147 = arith.constant 3 : i32
    %429 = vector.broadcast %c3_i32_147 : i32 to vector<1x128xi32>
    %430 = arith.cmpi eq, %5, %429 : vector<1x128xi32>
    %431 = vector.broadcast %319 : f32 to vector<1x128xf32>
    %432 = arith.select %430, %431, %428 : vector<1x128xi1>, vector<1x128xf32>
    %c4_i32_148 = arith.constant 4 : i32
    %433 = vector.broadcast %c4_i32_148 : i32 to vector<1x128xi32>
    %434 = arith.cmpi eq, %5, %433 : vector<1x128xi32>
    %435 = vector.broadcast %342 : f32 to vector<1x128xf32>
    %436 = arith.select %434, %435, %432 : vector<1x128xi1>, vector<1x128xf32>
    %c5_i32_149 = arith.constant 5 : i32
    %437 = vector.broadcast %c5_i32_149 : i32 to vector<1x128xi32>
    %438 = arith.cmpi eq, %5, %437 : vector<1x128xi32>
    %439 = vector.broadcast %279 : f32 to vector<1x128xf32>
    %440 = arith.select %438, %439, %436 : vector<1x128xi1>, vector<1x128xf32>
    %c1_150 = arith.constant 1 : index
    %c0_151 = arith.constant 0 : index
    %c0_152 = arith.constant 0 : index
    %441 = vector.load %arg8[%c1_150, %c0_151, %c0_152] : memref<2x1x128xf32, #tpu.memory_space<vmem>>, vector<1x1x128xf32>
    %442 = vector.shape_cast %441 : vector<1x1x128xf32> to vector<1x128xf32>
    %443 = vector.shape_cast %440 : vector<1x128xf32> to vector<1x1x128xf32>
    tpu.vector_store %arg8[%c1_150, %c0_151, %c0_152], %443 {strides = array<i32>} : memref<2x1x128xf32, #tpu.memory_space<vmem>>, vector<1x1x128xf32>,
    return
  }
}

</mosaic_0001>

<bundles_post_ra>
// kernel: tpu_custom_call.1
= control target key start
LH: loop header
LB: loop body
LE: loop exit
PB: predicated region body
PF: predicated region fallthrough
CT: control target
= control target key end

     0   :  { %15 = vsyncpa [#allocation3], 0  ;;  %v880_v1 = vmov 0   ;;  %s1256_s0 = inlined_call_operand.vmem [shape: f32[2,5,128], index: 0, kind: input, shape index: {}]   ;;  %s1257_s1 = inlined_call_operand.vmem [shape: s32[8,2], index: 1, kind: input, shape index: {}]   ;;  %s1258_s2 = inlined_call_operand.vmem [shape: s32[8,2], index: 2, kind: input, shape index: {}]   ;;  %s1259_s3 = inlined_call_operand.vmem [shape: f32[2,1,8], index: 3, kind: input, shape index: {}]   ;;  %s1260_s4 = inlined_call_operand.vmem [shape: f32[2,4,8], index: 4, kind: input, shape index: {}]   ;;  %s1261_s5 = inlined_call_operand.vmem [shape: f32[2,4,8], index: 5, kind: input, shape index: {}]   ;;  %s1262_s6 = inlined_call_operand.vmem [shape: s32[2,1,128], index: 6, kind: input, shape index: {}]   ;;  %s1263_s7 = inlined_call_operand.vmem [shape: f32[2,1], index: 7, kind: input, shape index: {}]   ;;  %s1264_s8 = inlined_call_operand.hbm [shape: f32[2,1,128], index: 8, kind: output, shape index: {0}]   ;;  %s1265_s9 = inlined_call_operand.hbm [shape: s32[2,1,128], index: 9, kind: output, shape index: {1}]  }
   0x1   :  { %v945_v0 = vld [vmem:[%s1257_s1] sm:$0xff]  ;;  %790 = vset.pattern.permute.xlu0 %v880_v1 }
   0x2   :  { %16 = vsyncpa [#allocation5], 0  ;;  %42 = vperm.xlu0 %790, %v945_v0   ;;  %v952_v2 = vld [vmem:[%s1258_s2] sm:$0xff]  ;;  %vm69_vm0 = vcmask 1044480   ;;  %v33_v10 = vlaneseq  ;;  %v881_v23 = vmov 1   ;;  %vm100_vm10 = vcmask 1040384  }
   0x3   :  { %v958_v3 = vld [vmem:[%s1256_s0] sm:$0x1f]  ;;  %792 = vset.pattern.permute.xlu1 %v881_v23  ;;  %vm219_vm13 = vcmask 1041408   ;;  %s884_s27 = smov 1e-12   ;;  %s885_s29 = smov 127  }
   0x4   :  { %v70_v4 = vsel %vm69_vm0, %v958_v3, -inf  ;;  %v964_v12 = vshrl.u32 %v33_v10, 7  ;;  %v977_v26 = vand.u32 127, %v33_v10  ;;  %s887_s12 = smov 1.0  }
   0x5   :  { %v71_v5 = vrot.slane %v70_v4, 4 }
   0x6   :  { %vm35_vm9 = vcmp.lt.s32.totalorder %v977_v26, 16 }
   0x7   :  { %v72_v6 = vmax.f32 %v70_v4, %v71_v5  ;;  %v882_v5 = vmov 1.0  }
   0x9   :  { %v73_v7 = vrot.slane %v72_v6, 2 }
   0xa   :  { %46 = vperm.xlu0 %790, %v952_v2  }
   0xb   :  { %v74_v8 = vmax.f32 %v72_v6, %v73_v7 }
   0xd   :  { %v75_v9 = vrot.slane %v74_v8, 1 }
   0xf   :  { %v962_v11 = vmax.f32 %v74_v8, %v75_v9 }
  0x11   :  { %vm139_vm1 = vcmp.eq.f32.partialorder %v958_v3, %v962_v11  ;;  %v77_v21 = vsub.f32 %v958_v3, %v962_v11 }
  0x12   :  { %v140_v13 = vsel %vm139_vm1, %v964_v12, 5  ;;  %791 = vset.pattern.permute.xlu0 %v881_v23 }
  0x13   :  { %v141_v14 = vsel %vm69_vm0, %v140_v13, 2147483647  ;;  %v78_v22 = vmul.f32 1.442695, %v77_v21  ;;  %371 = vperm.xlu0 %791, %v945_v0   ;;  %v883_v13 = vmov 0.0  }
  0x14   :  { %v142_v15 = vrot.slane %v141_v14, 4 }
  0x15   :  { %802 = vpow2.f32 %v78_v22 }
  0x16   :  { %vm143_vm2 = vcmp.lt.s32.totalorder %v141_v14, %v142_v15 }
  0x17   :  { %v144_v16 = vsel %vm143_vm2, %v141_v14, %v142_v15 }
  0x18   :  { %v145_v17 = vrot.slane %v144_v16, 2 }
  0x1a   :  { %vm146_vm3 = vcmp.lt.s32.totalorder %v144_v16, %v145_v17 }
  0x1b   :  { %v147_v18 = vsel %vm146_vm3, %v144_v16, %v145_v17  ;;  %v803_v24 = vpop.eup %802 }
  0x1c   :  { %v148_v19 = vrot.slane %v147_v18, 1  ;;  %v80_v25 = vsel %vm69_vm0, %v803_v24, 0.0 }
  0x1d   :  { %v81_v27 = vrot.slane %v80_v25, 4 }
  0x1e   :  { %vm149_vm4 = vcmp.lt.s32.totalorder %v147_v18, %v148_v19 }
  0x1f   :  { %v970_v20 = vsel %vm149_vm4, %v147_v18, %v148_v19  ;;  %v82_v29 = vadd.f32 %v81_v27, %v80_v25  ;;  %v1005_v18 = vld [vmem:[%s1256_s0 + $0x8] sm:$0x1f]  ;;  %vm152_vm4 = vcmp.ge.s32.totalorder %v945_v0, 0 }
  0x20   :  { %151 = vst [vmem:[#allocation4] sm:$0x1] %v970_v20  ;;  %vm213_vm11 = vcmp.ne.s32.totalorder %v970_v20, 4  ;;  %v399_v19 = vsel %vm69_vm0, %v1005_v18, -inf }
  0x21   :  { %v83_v36 = vrot.slane %v82_v29, 2  ;;  %vm214_vm12 = vmand %vm35_vm9, %vm213_vm11  ;;  %vm254_vm11 = vcmask 60416  }
  0x22   :  { %v215_v14 = vsel %vm214_vm12, 1.0, %v883_v13 }
  0x23   :  { %v84_v42 = vadd.f32 %v83_v36, %v82_v29 }
  0x25   :  { %v85_v47 = vrot.slane %v84_v42, 1 }
  0x27   :  { %v86_v51 = vadd.f32 %v85_v47, %v84_v42 }
  0x29   :  { %804 = vlog2.f32 %v86_v51 }
  0x2f   :  { %v805_v58 = vpop.eup %804 }
  0x30   :  { %v88_v60 = vmul.f32 0.6931472, %v805_v58 }
  0x32   :  { %v89_v63 = vadd.f32 %v88_v60, %v962_v11  ;;  %v798_v11 = vld [vmem:[%s1262_s6] ss:$0 sm:$0xff] }
  0x33   :  { %vm217_vm14 = vcmp.eq.s32.totalorder %v964_v12, %v798_v11 }
  0x34   :  { %v218_v15 = vsel %vm217_vm14, %v215_v14, 0.0 }
  0x35   :  { %v220_v16 = vsel %vm219_vm13, %v218_v15, 0.0 }
  0x3d   :  { %221 = vadd.xlane.f32.xlu0 %v220_v16 }
  0x74   :  { %v43_v28 = vpop.permute.xlu0 %42 }
  0x75   :  { %vm44_vm5 = vcmp.eq.s32.totalorder %v977_v26, %v43_v28 }
  0x76   :  { %v55_v30 = vsel %vm44_vm5, 1, %v880_v1  ;;  %v153_v31 = vsel %vm44_vm5, %v970_v20, 0  ;;  %v400_v20 = vrot.slane %v399_v19, 4 }
  0x77   :  { %v56_v32 = vrot.slane %v55_v30, 4  ;;  %v155_v33 = vshrl.u32 %v153_v31, 16  ;;  %v154_v41 = vand.u32 65535, %v153_v31 }
  0x78   :  { %v401_v21 = vmax.f32 %v399_v19, %v400_v20 }
  0x79   :  { %v57_v34 = vadd.s32 %v56_v32, %v55_v30  ;;  %v157_v35 = vcvt.s32.f32 %v155_v33  ;;  %v156_v46 = vcvt.s32.f32 %v154_v41 }
  0x7a   :  { %v402_v22 = vrot.slane %v401_v21, 2 }
  0x7b   :  { %v58_v37 = vrot.slane %v57_v34, 2  ;;  %160 = vadd.xlane.f32.xlu2 %v157_v35 }
  0x7c   :  { %v47_v38 = vpop.permute.xlu0 %46  ;;  %v403_v23 = vmax.f32 %v401_v21, %v402_v22 }
  0x7d   :  { %v59_v39 = vadd.s32 %v58_v37, %v57_v34  ;;  %v48_v40 = vsel %vm44_vm5, %v47_v38, 0 }
  0x7e   :  { %v49_v43 = vrot.slane %v48_v40, 4  ;;  %v404_v24 = vrot.slane %v403_v23, 1 }
  0x7f   :  { %v60_v45 = vrot.slane %v59_v39, 1 }
  0x80   :  { %v50_v44 = vadd.s32 %v49_v43, %v48_v40  ;;  %v1009_v25 = vmax.f32 %v403_v23, %v404_v24  ;;  %v1027_v43 = vld [vmem:[%s1260_s4] sm:$0xf] }
  0x81   :  { %v61_v50 = vadd.s32 %v60_v45, %v59_v39 }
  0x82   :  { %v51_v48 = vrot.slane %v50_v44, 2  ;;  %vm467_vm15 = vcmp.eq.f32.partialorder %v1005_v18, %v1009_v25 }
  0x83   :  { %158 = vadd.xlane.f32.xlu2 %v156_v46  ;;  %vm62_vm6 = vcmp.gt.s32.totalorder %v61_v50, 0  ;;  %v468_v27 = vsel %vm467_vm15, %v964_v12, 5  ;;  %v265_v46 = vmul.f32 0.5, %v1027_v43 }
  0x84   :  { %v52_v49 = vadd.s32 %v51_v48, %v50_v44  ;;  %v469_v28 = vsel %vm69_vm0, %v468_v27, 2147483647  ;;  %v1032_v44 = vld [vmem:[%s1261_s5] sm:$0xf]  ;;  %v1041_v48 = vsel %vm152_vm4, 1.0, %v883_v13  ;;  %v406_v27 = vsub.f32 %v1005_v18, %v1009_v25 }
  0x85   :  { %v470_v29 = vrot.slane %v469_v28, 4  ;;  %v1034_v45 = vpop.permute.xlu0 %371  ;;  %v271_v47 = vmul.f32 0.5, %v1032_v44 }
  0x86   :  { %v53_v52 = vrot.slane %v52_v49, 1 }
  0x87   :  { %vm471_vm1 = vcmp.lt.s32.totalorder %v469_v28, %v470_v29  ;;  %v273_v50 = vrot.slane %v271_v47, 2 }
  0x88   :  { %v54_v53 = vadd.s32 %v53_v52, %v52_v49  ;;  %v472_v30 = vsel %vm471_vm1, %v469_v28, %v470_v29  ;;  %v267_v49 = vrot.slane %v265_v46, 2  ;;  %vm225_vm1 = vcmask 1024  }
  0x89   :  { %v473_v31 = vrot.slane %v472_v30, 2 }
  0x8a   :  { %v63_v54 = vsel %vm62_vm6, %v54_v53, 4  ;;  %vm169_vm6 = vcmask 7168   ;;  %v269_v51 = vsub.f32 %v1027_v43, %v267_v49  ;;  %v270_v52 = vadd.f32 %v267_v49, %v1027_v43 }
  0x8b   :  { %vm68_vm7 = vcmp.eq.s32.totalorder %v964_v12, %v63_v54  ;;  %vm64_vm8 = vcmp.eq.s32.totalorder %v63_v54, 4  ;;  %vm474_vm2 = vcmp.lt.s32.totalorder %v472_v30, %v473_v31  ;;  %v275_v53 = vsub.f32 %v1032_v44, %v273_v50 }
  0x8c   :  { %v90_v55 = vsel %vm68_vm7, %v958_v3, 0.0  ;;  %v65_v6 = vsel %vm64_vm8, 0.1, %v882_v5  ;;  %v475_v32 = vsel %vm474_vm2, %v472_v30, %v473_v31  ;;  %vm373_vm8 = vcmp.eq.s32.totalorder %v977_v26, %v1034_v45 }
  0x8d   :  { %v91_v56 = vsel %vm69_vm0, %v90_v55, 0.0  ;;  %v66_v3 = vsel %vm35_vm9, %v65_v6, 0.0  ;;  %v476_v33 = vrot.slane %v475_v32, 1  ;;  %v276_v54 = vadd.f32 %v273_v50, %v1032_v44 }
  0x8e   :  { %v92_v57 = vrot.slane %v91_v56, 4  ;;  %v111_v17 = vsel %vm100_vm10, %v66_v3, 0.0  ;;  %v288_v58 = vmax.f32 %v269_v51, %v275_v53  ;;  %v277_v60 = vsub.f32 %v270_v52, %v269_v51 }
  0x8f   :  { %vm477_vm3 = vcmp.lt.s32.totalorder %v475_v32, %v476_v33  ;;  %v407_v31 = vmul.f32 1.442695, %v406_v27  ;;  %v384_v50 = vsel %vm373_vm8, 1, %v880_v1 }
  0x90   :  { %v93_v59 = vadd.f32 %v92_v57, %v91_v56  ;;  %v1015_v34 = vsel %vm477_vm3, %v475_v32, %v476_v33  ;;  %v181_v56 = vsel %vm169_vm6, %v1041_v48, 0.0  ;;  %v287_v57 = vmin.f32 %v270_v52, %v276_v54 }
  0x91   :  { %480 = vst [vmem:[#allocation4 + $0x1] sm:$0x1] %v1015_v34  ;;  %v481_v55 = vsel %vm373_vm8, %v1015_v34, 0 }
  0x92   :  { %v94_v61 = vrot.slane %v93_v59, 2  ;;  %v482_v21 = vand.u32 65535, %v481_v55 }
  0x94   :  { %v95_v62 = vadd.f32 %v94_v61, %v93_v59  ;;  %v483_v59 = vshrl.u32 %v481_v55, 16  ;;  %v278_v61 = vsub.f32 %v276_v54, %v275_v53  ;;  %v484_v30 = vcvt.s32.f32 %v482_v21 }
  0x96   :  { %v96_v4 = vrot.slane %v95_v62, 1 }
  0x98   :  { %v97_v7 = vadd.f32 %v96_v4, %v95_v62  ;;  %v289_v62 = vsub.f32 %v287_v57, %v288_v58  ;;  %v284_v4 = vrot.slane %v278_v61, 1 }
  0x9a   :  { %v98_v8 = vsub.f32 %v89_v63, %v97_v7  ;;  %v280_v63 = vrot.slane %v277_v60, 1  ;;  %v290_v6 = vmax.f32 %v289_v62, 0.0  ;;  %v313_v7 = vmax.f32 %v270_v52, %v276_v54  ;;  %v799_v52 = vld [vmem:[%s1259_s3] ss:$0 sm:$0xff] }
  0x9c   :  { %v99_v9 = vmul.f32 %v98_v8, %v66_v3  ;;  %v314_v8 = vmin.f32 %v269_v51, %v275_v53  ;;  %v485_v3 = vcvt.s32.f32 %v483_v59  ;;  %v292_v11 = vrot.slane %v290_v6, 1 }
  0x9d   :  { %v248_v51 = vsub.f32 %v1027_v43, %v1032_v44 }
  0x9e   :  { %v101_v10 = vsel %vm100_vm10, %v99_v9, 0.0  ;;  %v282_v9 = vmul.f32 %v280_v63, %v277_v60  ;;  %v315_v14 = vsub.f32 %v313_v7, %v314_v8  ;;  %v1055_v15 = vmul.f32 %v292_v11, %v290_v6 }
  0x9f   :  { %102 = vadd.xlane.f32.xlu1 %v101_v10  ;;  %v286_v10 = vmul.f32 %v284_v4, %v278_v61  ;;  %v249_v57 = vand.u32 2147483647, %v248_v51 }
  0xa1   :  { %v295_v16 = vadd.f32 %v286_v10, %v282_v9  ;;  %v253_v4 = vmul.f32 %v799_v52, %v249_v57 }
  0xa3   :  { %v1058_v19 = vsub.f32 %v295_v16, %v1055_v15  ;;  %v255_v10 = vsel %vm254_vm11, %v253_v4, 0.0 }
  0xa5   :  { %v297_v22 = vmax.f32 %v1058_v19, 1e-07 }
  0xa7   :  { %112 = vadd.xlane.f32.xlu1 %v111_v17  ;;  %v317_v17 = vrot.slane %v315_v14, 1  ;;  %806 = vrcp.f32 %v297_v22  ;;  %vm303_vm12 = vweird.f32 %v297_v22  ;;  %v307_v1 = vand.u32 2147483647, %v297_v22 }
  0xa8   :  { %v309_v59 = vand.u32 2147483648, %v297_v22 }
  0xa9   :  { %v1060_v20 = vmul.f32 %v317_v17, %v315_v14  ;;  %vm1089_vm2 = vcmp.eq.f32.partialorder %v307_v1, 8.507059e+37 }
  0xaa   :  { %v310_v8 = vor.u32 1.1754944e-38, %v309_v59 }
  0xab   :  { %v1064_v24 = vmax.f32 %v1060_v20, 1e-07  ;;  %v320_v27 = vsub.f32 %v1060_v20, %v1058_v19 }
  0xad   :  { %808 = vrcp.f32 %v1064_v24  ;;  %v807_v33 = vpop.eup %806  ;;  %vm327_vm3 = vweird.f32 %v1064_v24  ;;  %v331_v16 = vand.u32 2147483647, %v1064_v24 }
  0xae   :  { %810 = vpow2.f32 %v407_v31  ;;  %vm304_vm14 = vweird.f32 %v807_v33 }
  0xaf   :  { %vm1085_vm15 = vmor %vm303_vm12, %vm304_vm14  ;;  %vm332_vm12 = vcmp.eq.f32.partialorder %v331_v16, 8.507059e+37  ;;  %vm340_vm14 = vcmask 57344  }
  0xb0   :  { %v222_v53 = vpop.xlane.xlu0 %221 }
  0xc0   :  { %375 = vperm.xlu1 %792, %v952_v2  }
  0xee   :  { %v161_v35 = vpop.xlane.xlu2 %160 }
  0xef   :  { %v163_v36 = vcvt.f32.s32 %v161_v35 }
  0xf1   :  { %v164_v38 = vshll.u32 %v163_v36, 16  ;;  %v809_v36 = vpop.eup %808 }
  0xf2   :  { %v811_v60 = vpop.eup %810 }
  0xf3   :  { %v409_v17 = vsel %vm69_vm0, %v811_v60, 0.0 }
  0xf4   :  { %v410_v31 = vrot.slane %v409_v17, 4 }
  0xf6   :  { %v159_v37 = vpop.xlane.xlu2 %158 }
  0xf7   :  { %v162_v39 = vcvt.f32.s32 %v159_v37 }
  0xf9   :  { %v165_v40 = vadd.s32 %v164_v38, %v162_v39  ;;  %v299_v38 = vmul.f32 %v807_v33, %v297_v22 }
  0xfb   :  { %vm166_vm5 = vcmp.eq.s32.totalorder %v165_v40, %v952_v2 }
  0xfc   :  { %vm167_vm7 = vmand %vm152_vm4, %vm166_vm5  ;;  %vm328_vm5 = vweird.f32 %v809_v36 }
  0xfd   :  { %v168_v41 = vsel %vm167_vm7, 1.0, %v883_v13  ;;  %vm1098_vm7 = vmor %vm327_vm3, %vm328_vm5 }
  0xfe   :  { %v170_v42 = vsel %vm169_vm6, %v168_v41, 0.0  ;;  %v323_v41 = vmul.f32 %v809_v36, %v1064_v24 }
  0xff   :  { %171 = vadd.xlane.f32.xlu2 %v170_v42  ;;  %v300_v42 = vsub.f32 1.0, %v299_v38  ;;  %v411_v38 = vadd.f32 %v410_v31, %v409_v17 }
 0x100   :  { %v324_v49 = vsub.f32 1.0, %v323_v41 }
 0x101   :  { %v301_v54 = vmul.f32 %v807_v33, %v300_v42 }
 0x102   :  { %v325_v63 = vmul.f32 %v809_v36, %v324_v49 }
 0x103   :  { %v302_v44 = vadd.f32 %v807_v33, %v301_v54 }
 0x104   :  { %v326_v9 = vadd.f32 %v809_v36, %v325_v63 }
 0x105   :  { %v306_v7 = vsel %vm1085_vm15, %v807_v33, %v302_v44 }
 0x106   :  { %v311_v22 = vsel %vm1089_vm2, %v310_v8, %v306_v7 }
 0x107   :  { %182 = vadd.xlane.f32.xlu2 %v181_v56  ;;  %v1082_v56 = vld [vmem:[%s1263_s7] sm:$0x3]  ;;  %s891_s7 = smov [#allocation2]  }
 0x108   :  { %v223_v43 = vsub.f32 %v222_v53, %v1082_v56 }
 0x10a   :  { %v224_v6 = vand.u32 2147483647, %v223_v43 }
 0x10c   :  { %v226_v11 = vsel %vm225_vm1, %v224_v6, 0.0 }
 0x10d   :  { %227 = vadd.xlane.f32.xlu1 %v226_v11 }
 0x10f   :  { %488 = vadd.xlane.f32.xlu2 %v485_v3 }
 0x112   :  { %v103_v23 = vpop.xlane.xlu1 %102 }
 0x113   :  { %v104_v28 = vrot.slane %v103_v23, 4 }
 0x115   :  { %v105_v29 = vadd.f32 %v104_v28, %v103_v23  ;;  %v333_v23 = vand.u32 2147483648, %v1064_v24  ;;  %v330_v28 = vsel %vm1098_vm7, %v809_v36, %v326_v9  ;;  %v245_v24 = vld [vmem:[%s1259_s3] sm:$0x1]  ;;  %v412_v36 = vrot.slane %v411_v38, 2 }
 0x117   :  { %v106_v32 = vrot.slane %v105_v29, 2  ;;  %486 = vadd.xlane.f32.xlu2 %v484_v30  ;;  %v334_v30 = vor.u32 1.1754944e-38, %v333_v23 }
 0x119   :  { %v107_v35 = vadd.f32 %v106_v32, %v105_v29  ;;  %v385_v29 = vrot.slane %v384_v50, 4  ;;  %v312_v32 = vmul.f32 %v311_v22, %v1055_v15  ;;  %v335_v33 = vsel %vm332_vm12, %v334_v30, %v330_v28 }
 0x11a   :  { %v113_v37 = vpop.xlane.xlu1 %112 }
 0x11b   :  { %v114_v39 = vrot.slane %v113_v37, 4  ;;  %v108_v40 = vrot.slane %v107_v35, 1 }
 0x11d   :  { %v115_v46 = vadd.f32 %v114_v39, %v113_v37  ;;  %v109_v47 = vadd.f32 %v108_v40, %v107_v35  ;;  %v336_v35 = vmul.f32 %v335_v33, %v320_v27  ;;  %v386_v37 = vadd.s32 %v385_v29, %v384_v50 }
 0x11f   :  { %v116_v55 = vrot.slane %v115_v46, 2  ;;  %740 = vpush %v109_v47  ;;  %256 = vadd.xlane.f32.xlu2 %v255_v10  ;;  %v337_v39 = vsub.f32 %v312_v32, %v336_v35  ;;  %v387_v20 = vrot.slane %v386_v37, 2  ;;  %v413_v47 = vadd.f32 %v412_v36, %v411_v38 }
 0x121   :  { %v117_v61 = vadd.f32 %v116_v55, %v115_v46  ;;  %v338_v19 = vsub.f32 1.0, %v337_v39  ;;  %v388_v46 = vadd.s32 %v387_v20, %v386_v37  ;;  %v414_v52 = vrot.slane %v413_v47, 1 }
 0x123   :  { %v118_v3 = vrot.slane %v117_v61, 1  ;;  %v339_v40 = vmul.f32 %v338_v19, %v245_v24  ;;  %v389_v51 = vrot.slane %v388_v46, 1  ;;  %v415_v1 = vadd.f32 %v414_v52, %v413_v47 }
 0x125   :  { %v119_v21 = vadd.f32 %v118_v3, %v117_v61  ;;  %v341_v42 = vsel %vm340_vm14, %v339_v40, 0.0  ;;  %v390_v55 = vadd.s32 %v389_v51, %v388_v46  ;;  %812 = vlog2.f32 %v415_v1 }
 0x126   :  { %v886_v1 = vmov 2.0  }
 0x127   :  { %742 = vpush %v119_v21  ;;  %342 = vadd.xlane.f32.xlu2 %v341_v42  ;;  %vm391_vm15 = vcmp.gt.s32.totalorder %v390_v55, 0 }
 0x12b   :  { %v813_v60 = vpop.eup %812 }
 0x12c   :  { %v417_v62 = vmul.f32 0.6931472, %v813_v60 }
 0x12e   :  { %v418_v6 = vadd.f32 %v417_v62, %v1009_v25 }
 0x132   :  { %v376_v41 = vpop.permute.xlu1 %375 }
 0x133   :  { %v377_v15 = vsel %vm373_vm8, %v376_v41, 0 }
 0x134   :  { %v378_v49 = vrot.slane %v377_v15, 4 }
 0x136   :  { %v379_v50 = vadd.s32 %v378_v49, %v377_v15 }
 0x138   :  { %v380_v53 = vrot.slane %v379_v50, 2 }
 0x13a   :  { %v381_v54 = vadd.s32 %v380_v53, %v379_v50 }
 0x13c   :  { %v382_v57 = vrot.slane %v381_v54, 1 }
 0x13e   :  { %v383_v43 = vadd.s32 %v382_v57, %v381_v54 }
 0x140   :  { %v392_v44 = vsel %vm391_vm15, %v383_v43, 4 }
 0x141   :  { %vm398_vm2 = vcmp.eq.s32.totalorder %v964_v12, %v392_v44  ;;  %vm393_vm8 = vcmp.eq.s32.totalorder %v392_v44, 4 }
 0x142   :  { %v419_v45 = vsel %vm398_vm2, %v1005_v18, 0.0  ;;  %v394_v8 = vsel %vm393_vm8, 0.1, %v882_v5 }
 0x143   :  { %v420_v58 = vsel %vm69_vm0, %v419_v45, 0.0  ;;  %v395_v10 = vsel %vm35_vm9, %v394_v8, 0.0 }
 0x144   :  { %v421_v59 = vrot.slane %v420_v58, 4  ;;  %v439_v5 = vsel %vm100_vm10, %v395_v10, 0.0 }
 0x146   :  { %v422_v61 = vadd.f32 %v421_v59, %v420_v58 }
 0x148   :  { %v423_v63 = vrot.slane %v422_v61, 2 }
 0x14a   :  { %v424_v4 = vadd.f32 %v423_v63, %v422_v61 }
 0x14c   :  { %v425_v7 = vrot.slane %v424_v4, 1 }
 0x14e   :  { %v426_v3 = vadd.f32 %v425_v7, %v424_v4 }
 0x150   :  { %v427_v9 = vsub.f32 %v418_v6, %v426_v3  ;;  %s1127_s25 = spop %740 }
 0x152   :  { %v428_v18 = vmul.f32 %v427_v9, %v395_v10 }
 0x154   :  { %v429_v11 = vsel %vm100_vm10, %v428_v18, 0.0 }
 0x155   :  { %430 = vadd.xlane.f32.xlu2 %v429_v11 }
 0x158   :  { %s1129_s26 = spop %742 }
 0x159   :  { %s121_s28 = smax.f32 %s884_s27, %s1129_s26 }
 0x15a   :  { %v122_v25 = vstv %s121_s28 }
 0x15b   :  { %814 = vrcp.f32 %v122_v25  ;;  %v134_v21 = vand.u32 2147483648, %v122_v25  ;;  %v132_v23 = vand.u32 2147483647, %v122_v25  ;;  %vm128_vm3 = vweird.f32 %v122_v25 }
 0x15c   :  { %816 = vrcp.f32 %v886_v1 }
 0x15d   :  { %440 = vadd.xlane.f32.xlu2 %v439_v5  ;;  %v135_v28 = vor.u32 1.1754944e-38, %v134_v21  ;;  %vm133_vm7 = vcmp.eq.f32.partialorder %v132_v23, 8.507059e+37 }
 0x161   :  { %v815_v14 = vpop.eup %814 }
 0x162   :  { %v124_v16 = vmul.f32 %v815_v14, %v122_v25  ;;  %vm129_vm0 = vweird.f32 %v815_v14  ;;  %v817_v44 = vpop.eup %816 }
 0x163   :  { %vm130_vm5 = vmor %vm128_vm3, %vm129_vm0  ;;  %v237_v59 = vmul.f32 2.0, %v817_v44  ;;  %vm241_vm2 = vweird.f32 %v817_v44  ;;  %vm351_vm3 = vcmp.eq.s32.totalorder %v977_v26, 0 }
 0x164   :  { %v125_v17 = vsub.f32 1.0, %v124_v16 }
 0x165   :  { %v238_v63 = vsub.f32 1.0, %v237_v59 }
 0x166   :  { %v126_v22 = vmul.f32 %v815_v14, %v125_v17 }
 0x167   :  { %v239_v3 = vmul.f32 %v817_v44, %v238_v63 }
 0x168   :  { %v127_v27 = vadd.f32 %v815_v14, %v126_v22 }
 0x169   :  { %v240_v16 = vadd.f32 %v817_v44, %v239_v3 }
 0x16a   :  { %v131_v29 = vsel %vm130_vm5, %v815_v14, %v127_v27  ;;  %vm354_vm5 = vcmp.eq.s32.totalorder %v977_v26, 1 }
 0x16b   :  { %v136_v30 = vsel %vm133_vm7, %v135_v28, %v131_v29  ;;  %vm357_vm7 = vcmp.eq.s32.totalorder %v977_v26, 2 }
 0x16c   :  { %744 = vpush %v136_v30 }
 0x172   :  { %v172_v31 = vpop.xlane.xlu2 %171 }
 0x173   :  { %v173_v32 = vrot.slane %v172_v31, 4 }
 0x175   :  { %v174_v33 = vadd.f32 %v173_v32, %v172_v31 }
 0x177   :  { %v175_v35 = vrot.slane %v174_v33, 2 }
 0x179   :  { %v176_v37 = vadd.f32 %v175_v35, %v174_v33  ;;  %v242_v33 = vsel %vm241_vm2, %v817_v44, %v240_v16 }
 0x17a   :  { %v183_v38 = vpop.xlane.xlu2 %182 }
 0x17b   :  { %v184_v39 = vrot.slane %v183_v38, 4  ;;  %v177_v24 = vrot.slane %v176_v37, 1 }
 0x17d   :  { %v185_v19 = vadd.f32 %v184_v39, %v183_v38  ;;  %v178_v20 = vadd.f32 %v177_v24, %v176_v37 }
 0x17f   :  { %v186_v36 = vrot.slane %v185_v19, 2  ;;  %746 = vpush %v178_v20 }
 0x180   :  { %v228_v55 = vpop.xlane.xlu1 %227 }
 0x181   :  { %v187_v40 = vadd.f32 %v186_v36, %v185_v19  ;;  %v229_v57 = vrot.slane %v228_v55, 4 }
 0x182   :  { %v489_v41 = vpop.xlane.xlu2 %488 }
 0x183   :  { %v188_v42 = vrot.slane %v187_v40, 1  ;;  %v491_v15 = vcvt.f32.s32 %v489_v41 }
 0x185   :  { %v189_v46 = vadd.f32 %v188_v42, %v187_v40  ;;  %v492_v49 = vshll.u32 %v491_v15, 16 }
 0x187   :  { %748 = vpush %v189_v46 }
 0x18a   :  { %v487_v47 = vpop.xlane.xlu2 %486 }
 0x18b   :  { %v490_v50 = vcvt.f32.s32 %v487_v47 }
 0x18d   :  { %v493_v51 = vadd.s32 %v492_v49, %v490_v50 }
 0x18f   :  { %vm494_vm10 = vcmp.eq.s32.totalorder %v493_v51, %v952_v2 }
 0x190   :  { %vm495_vm12 = vmand %vm152_vm4, %vm494_vm10  ;;  %vm360_vm10 = vcmp.eq.s32.totalorder %v977_v26, 3 }
 0x191   :  { %v496_v52 = vsel %vm495_vm12, 1.0, %v883_v13  ;;  %vm363_vm12 = vcmp.eq.s32.totalorder %v977_v26, 4 }
 0x192   :  { %v793_v53 = vpack.i.bf16 %v1041_v48, %v496_v52  ;;  %v257_v54 = vpop.xlane.xlu2 %256  ;;  %v230_v48 = vadd.f32 %v229_v57, %v228_v55  ;;  %v800_v57 = vld [vmem:[%s1262_s6 + $0x1] ss:$0 sm:$0xff] }
 0x193   :  { %v258_v2 = vrot.slane %v257_v54, 4 }
 0x194   :  { %794 = vrot.lane.b32.xlu0 %v793_v53, %s885_s29  ;;  %v231_v61 = vrot.slane %v230_v48, 2 }
 0x195   :  { %v259_v58 = vadd.f32 %v258_v2, %v257_v54 }
 0x196   :  { %v232_v7 = vadd.f32 %v231_v61, %v230_v48 }
 0x197   :  { %v260_v62 = vrot.slane %v259_v58, 2 }
 0x198   :  { %v233_v25 = vrot.slane %v232_v7, 1 }
 0x199   :  { %v261_v9 = vadd.f32 %v260_v62, %v259_v58 }
 0x19a   :  { %v343_v43 = vpop.xlane.xlu2 %342  ;;  %v234_v29 = vadd.f32 %v233_v25, %v232_v7 }
 0x19b   :  { %v344_v0 = vrot.slane %v343_v43, 4  ;;  %v262_v17 = vrot.slane %v261_v9, 1 }
 0x19d   :  { %s1139_s30 = spop %744  ;;  %v345_v60 = vadd.f32 %v344_v0, %v343_v43  ;;  %v263_v35 = vadd.f32 %v262_v17, %v261_v9  ;;  %v367_v43 = vstv %s1129_s26  ;;  %s705_s26 = sshll.u32 %s1264_s8, 4  ;;  %s706_s26 = int_to_ptr.hbm [resolvable:$true] %s705_s26 }
 0x19e   :  { %s138_s14 = smul.f32 %s1139_s30, %s1127_s25 }
 0x19f   :  { %v346_v4 = vrot.slane %v345_v60, 2 }
 0x1a0   :  { %v352_v47 = vstv %s138_s14 }
 0x1a1   :  { %v347_v18 = vadd.f32 %v346_v4, %v345_v60  ;;  %v353_v49 = vsel %vm351_vm3, %v352_v47, 0.0 }
 0x1a3   :  { %v348_v23 = vrot.slane %v347_v18, 1 }
 0x1a5   :  { %v349_v37 = vadd.f32 %v348_v23, %v347_v18  ;;  %v1193_v18 = vld [vmem:[%s1260_s4 + $0x4] sm:$0xf] }
 0x1a6   :  { %v600_v25 = vmul.f32 0.5, %v1193_v18 }
 0x1b0   :  { %s1141_s10 = spop %746 }
 0x1b1   :  { %s192_s1 = smul.f32 100.0, %s1141_s10 }
 0x1b8   :  { %s1143_s11 = spop %748 }
 0x1b9   :  { %s193_s13 = smax.f32 %s887_s12, %s1143_s11  ;;  %p191_p0 = scmp.gt.f32.partialorder %s1143_s11, 0.0 }
 0x1ba   :  { %v194_v45 = vstv %s193_s13  ;;  %s888_s11 = smov [#allocation4]  }
 0x1bb   :  { %818 = vrcp.f32 %v194_v45  ;;  %v206_v11 = vand.u32 2147483648, %v194_v45  ;;  %v204_v14 = vand.u32 2147483647, %v194_v45  ;;  %vm200_vm15 = vweird.f32 %v194_v45  ;;  %s716_s13 = sshll.u32 %s888_s11, 4  ;;  %s717_s13 = int_to_ptr.vmem [resolvable:$true] %s716_s13 }
 0x1bd   :  { %v207_v28 = vor.u32 1.1754944e-38, %v206_v11  ;;  %vm205_vm0 = vcmp.eq.f32.partialorder %v204_v14, 8.507059e+37  ;;  %v1198_v11 = vld [vmem:[%s1261_s5 + $0x4] sm:$0xf]  ;;  %v602_v14 = vrot.slane %v600_v25, 2 }
 0x1bf   :  { %v604_v17 = vsub.f32 %v1193_v18, %v602_v14 }
 0x1c1   :  { %v819_v6 = vpop.eup %818 }
 0x1c2   :  { %v196_v8 = vmul.f32 %v819_v6, %v194_v45  ;;  %vm201_vm4 = vweird.f32 %v819_v6 }
 0x1c3   :  { %vm202_vm8 = vmor %vm200_vm15, %vm201_vm4  ;;  %vm548_vm4 = vcmp.ne.s32.totalorder %v1015_v34, 4  ;;  %vm1266_vm15 = vcmp.eq.s32.totalorder %v977_v26, 5 }
 0x1c4   :  { %v197_v10 = vsub.f32 1.0, %v196_v8  ;;  %vm549_vm2 = vmand %vm35_vm9, %vm548_vm4 }
 0x1c5   :  { %v550_v59 = vsel %vm549_vm2, 1.0, %v883_v13 }
 0x1c6   :  { %v198_v5 = vmul.f32 %v819_v6, %v197_v10 }
 0x1c8   :  { %v431_v21 = vpop.xlane.xlu2 %430  ;;  %v199_v22 = vadd.f32 %v819_v6, %v198_v5  ;;  %v606_v5 = vmul.f32 0.5, %v1198_v11 }
 0x1c9   :  { %v432_v27 = vrot.slane %v431_v21, 4 }
 0x1ca   :  { %v203_v30 = vsel %vm202_vm8, %v819_v6, %v199_v22  ;;  %vm552_vm8 = vcmp.eq.s32.totalorder %v964_v12, %v800_v57  ;;  %v608_v16 = vrot.slane %v606_v5, 2 }
 0x1cb   :  { %v433_v31 = vadd.f32 %v432_v27, %v431_v21  ;;  %v208_v32 = vsel %vm205_vm0, %v207_v28, %v203_v30  ;;  %v553_v60 = vsel %vm552_vm8, %v550_v59, 0.0  ;;  %v605_v21 = vadd.f32 %v1193_v18, %v602_v14 }
 0x1cc   :  { %750 = vpush %v208_v32  ;;  %v554_v61 = vsel %vm219_vm13, %v553_v60, 0.0  ;;  %v610_v22 = vsub.f32 %v1198_v11, %v608_v16  ;;  %v611_v23 = vadd.f32 %v1198_v11, %v608_v16 }
 0x1cd   :  { %v434_v38 = vrot.slane %v433_v31, 2  ;;  %752 = vpush %v234_v29  ;;  %v612_v29 = vsub.f32 %v605_v21, %v604_v17 }
 0x1ce   :  { %754 = vpush %v242_v33  ;;  %v622_v27 = vmin.f32 %v605_v21, %v611_v23  ;;  %v623_v28 = vmax.f32 %v604_v17, %v610_v22  ;;  %v613_v30 = vsub.f32 %v611_v23, %v610_v22 }
 0x1cf   :  { %756 = vpush %v263_v35  ;;  %v435_v39 = vadd.f32 %v434_v38, %v433_v31  ;;  %v615_v32 = vrot.slane %v612_v29, 1  ;;  %v649_v38 = vmin.f32 %v604_v17, %v610_v22 }
 0x1d0   :  { %758 = vpush %v349_v37  ;;  %v441_v24 = vpop.xlane.xlu2 %440  ;;  %v624_v31 = vsub.f32 %v622_v27, %v623_v28  ;;  %v619_v33 = vrot.slane %v613_v30, 1  ;;  %v648_v37 = vmax.f32 %v605_v21, %v611_v23 }
 0x1d1   :  { %v442_v19 = vrot.slane %v441_v24, 4  ;;  %v436_v20 = vrot.slane %v435_v39, 1 }
 0x1d2   :  { %v625_v35 = vmax.f32 %v624_v31, 0.0 }
 0x1d3   :  { %v443_v36 = vadd.f32 %v442_v19, %v441_v24  ;;  %v437_v40 = vadd.f32 %v436_v20, %v435_v39  ;;  %v617_v39 = vmul.f32 %v615_v32, %v612_v29  ;;  %v621_v24 = vmul.f32 %v619_v33, %v613_v30 }
 0x1d4   :  { %v627_v19 = vrot.slane %v625_v35, 1  ;;  %v650_v20 = vsub.f32 %v648_v37, %v649_v38 }
 0x1d5   :  { %v444_v41 = vrot.slane %v443_v36, 2  ;;  %760 = vpush %v437_v40  ;;  %v630_v40 = vadd.f32 %v621_v24, %v617_v39 }
 0x1d7   :  { %v445_v42 = vadd.f32 %v444_v41, %v443_v36  ;;  %v629_v36 = vmul.f32 %v627_v19, %v625_v35  ;;  %v652_v41 = vrot.slane %v650_v20, 1 }
 0x1d9   :  { %v446_v46 = vrot.slane %v445_v42, 1 }
 0x1db   :  { %v447_v15 = vadd.f32 %v446_v46, %v445_v42  ;;  %v631_v42 = vsub.f32 %v630_v40, %v629_v36  ;;  %v654_v46 = vmul.f32 %v652_v41, %v650_v20 }
 0x1dd   :  { %762 = vpush %v447_v15  ;;  %v632_v15 = vmax.f32 %v631_v42, 1e-07  ;;  %v656_v47 = vmax.f32 %v654_v46, 1e-07 }
 0x1df   :  { %vm638_vm13 = vweird.f32 %v632_v15 }
 0x1fd   :  { %s751_s2 = spop %750 }
 0x1fe   :  { %s210_s15 = smul.f32 %s751_s2, %s192_s1  ;;  %s753_s16 = spop %752 }
 0x1ff   :  { %s1152_s0 = spop %754  ;;  %s718_s2 = sshll.u32 %s1265_s9, 4  ;;  %s719_s2 = int_to_ptr.hbm [resolvable:$true] %s718_s2 }
 0x200   :  { %s1275_s15 = smov (!%p191_p0, %s210_s15), 100.0  ;;  %s244_s17 = smul.f32 %s1152_s0, %s753_s16 }
 0x201   :  { %s757_s18 = spop %756  ;;  %v361_v50 = vstv %s1275_s15  ;;  %s889_s15 = smov 16  }
 0x202   :  { %v355_v51 = vstv %s757_s18  ;;  %s759_s19 = spop %758  ;;  %v364_v52 = vstv %s244_s17  ;;  %s890_s16 = smov 1  }
 0x203   :  { %v356_v53 = vsel %vm354_vm5, %v355_v51, %v353_v49  ;;  %v358_v54 = vstv %s759_s19 }
 0x204   :  { %v359_v55 = vsel %vm357_vm7, %v358_v54, %v356_v53  ;;  %724 = dma.vmem_to_hbm [thread:$0]  %s717_s13, 32, %s719_s2, [#allocation5], %s889_s15, %s889_s15, %s890_s16  }
 0x205   :  { %v362_v1 = vsel %vm360_vm10, %v361_v50, %v359_v55 }
 0x206   :  { %v365_v2 = vsel %vm363_vm12, %v364_v52, %v362_v1  ;;  %v795_v44 = vpop.permute.xlu0 %794  ;;  %s1183_s6 = spop %760  ;;  %v644_v1 = vand.u32 2147483648, %v632_v15 }
 0x207   :  { %v797_v34 = vunpack.i.h.bf16 %v795_v44  ;;  %v796_v0 = vunpack.i.l.bf16 %v795_v44  ;;  %v368_v48 = vsel %vm1266_vm15, %v367_v43, %v365_v2  ;;  %v668_v43 = vand.u32 2147483648, %v656_v47 }
 0x208   :  { %369 = vst [vmem:[#allocation2] sm:$0x1] %v368_v48  ;;  %v642_v44 = vand.u32 2147483647, %v632_v15 }
 0x209   :  { %v515_v45 = vsel %vm169_vm6, %v797_v34, 0.0  ;;  %v501_v58 = vsel %vm169_vm6, %v796_v0, 0.0  ;;  %v645_v34 = vor.u32 1.1754944e-38, %v644_v1 }
 0x20a   :  { %516 = vadd.xlane.f32.xlu1 %v515_v45  ;;  %502 = vadd.xlane.f32.xlu2 %v501_v58  ;;  %v655_v45 = vsub.f32 %v654_v46, %v631_v42  ;;  %v666_v58 = vand.u32 2147483647, %v656_v47 }
 0x20c   :  { %vm667_vm15 = vcmp.eq.f32.partialorder %v666_v58, 8.507059e+37 }
 0x20e   :  { %s1185_s22 = spop %762 }
 0x20f   :  { %s449_s23 = smax.f32 %s884_s27, %s1185_s22 }
 0x210   :  { %v450_v62 = vstv %s449_s23 }
 0x211   :  { %820 = vrcp.f32 %v450_v62  ;;  %v462_v6 = vand.u32 2147483648, %v450_v62  ;;  %v460_v7 = vand.u32 2147483647, %v450_v62  ;;  %vm456_vm6 = vweird.f32 %v450_v62 }
 0x212   :  { %555 = vadd.xlane.f32.xlu2 %v554_v61  ;;  %822 = vrcp.f32 %v632_v15  ;;  %v669_v61 = vor.u32 1.1754944e-38, %v668_v43 }
 0x213   :  { %v463_v3 = vor.u32 1.1754944e-38, %v462_v6  ;;  %vm461_vm4 = vcmp.eq.f32.partialorder %v460_v7, 8.507059e+37  ;;  %824 = vrcp.f32 %v656_v47 }
 0x217   :  { %v821_v63 = vpop.eup %820 }
 0x218   :  { %v452_v4 = vmul.f32 %v821_v63, %v450_v62  ;;  %vm457_vm9 = vweird.f32 %v821_v63  ;;  %v823_v49 = vpop.eup %822 }
 0x219   :  { %vm458_vm0 = vmor %vm456_vm6, %vm457_vm9  ;;  %v825_v50 = vpop.eup %824  ;;  %v634_v51 = vmul.f32 %v823_v49, %v632_v15  ;;  %vm639_vm2 = vweird.f32 %v823_v49  ;;  %vm662_vm9 = vweird.f32 %v656_v47 }
 0x21a   :  { %v453_v13 = vsub.f32 1.0, %v452_v4  ;;  %v658_v52 = vmul.f32 %v825_v50, %v656_v47  ;;  %vm640_vm8 = vmor %vm638_vm13, %vm639_vm2  ;;  %vm663_vm6 = vweird.f32 %v825_v50  ;;  %v801_v4 = vld [vmem:[%s1259_s3 + $0x1] ss:$0 sm:$0xff] }
 0x21b   :  { %v635_v53 = vsub.f32 1.0, %v634_v51 }
 0x21c   :  { %v454_v12 = vmul.f32 %v821_v63, %v453_v13  ;;  %v659_v54 = vsub.f32 1.0, %v658_v52 }
 0x21d   :  { %v636_v55 = vmul.f32 %v823_v49, %v635_v53 }
 0x21e   :  { %v455_v8 = vadd.f32 %v821_v63, %v454_v12  ;;  %v660_v57 = vmul.f32 %v825_v50, %v659_v54 }
 0x21f   :  { %v637_v2 = vadd.f32 %v823_v49, %v636_v55 }
 0x220   :  { %v459_v9 = vsel %vm458_vm0, %v821_v63, %v455_v8  ;;  %v661_v0 = vadd.f32 %v825_v50, %v660_v57  ;;  %vm643_vm0 = vcmp.eq.f32.partialorder %v642_v44, 8.507059e+37  ;;  %v584_v63 = vsub.f32 %v1193_v18, %v1198_v11  ;;  %v737_v8 = vld [vmem:[%s1259_s3 + $0x1] sm:$0x1] }
 0x221   :  { %v464_v10 = vsel %vm461_vm4, %v463_v3, %v459_v9  ;;  %v641_v48 = vsel %vm640_vm8, %v823_v49, %v637_v2  ;;  %vm664_vm4 = vmor %vm662_vm9, %vm663_vm6 }
 0x222   :  { %764 = vpush %v464_v10  ;;  %v646_v59 = vsel %vm643_vm0, %v645_v34, %v641_v48  ;;  %v665_v60 = vsel %vm664_vm4, %v825_v50, %v661_v0  ;;  %v585_v12 = vand.u32 2147483647, %v584_v63 }
 0x223   :  { %v647_v62 = vmul.f32 %v646_v59, %v629_v36  ;;  %v670_v13 = vsel %vm667_vm15, %v669_v61, %v665_v60 }
 0x224   :  { %v671_v6 = vmul.f32 %v670_v13, %v655_v45  ;;  %v589_v3 = vmul.f32 %v801_v4, %v585_v12 }
 0x226   :  { %v672_v7 = vsub.f32 %v647_v62, %v671_v6  ;;  %v590_v10 = vsel %vm254_vm11, %v589_v3, 0.0 }
 0x227   :  { %591 = vadd.xlane.f32.xlu0 %v590_v10 }
 0x228   :  { %v673_v9 = vsub.f32 1.0, %v672_v7 }
 0x22a   :  { %v674_v25 = vmul.f32 %v737_v8, %v673_v9  ;;  %v695_v9 = vstv %s1185_s22 }
 0x22c   :  { %v675_v18 = vsel %vm340_vm14, %v674_v25, 0.0 }
 0x22d   :  { %676 = vadd.xlane.f32.xlu2 %v675_v18 }
 0x253   :  { %s1218_s3 = spop %764 }
 0x254   :  { %s466_s17 = smul.f32 %s1218_s3, %s1183_s6  ;;  %s703_s6 = sshll.u32 %s891_s7, 4  ;;  %s704_s6 = int_to_ptr.vmem [resolvable:$true] %s703_s6 }
 0x256   :  { %v685_v62 = vstv %s466_s17 }
 0x257   :  { %v686_v63 = vsel %vm351_vm3, %v685_v62, 0.0  ;;  %vm1273_vm3 = vcmp.eq.s32.totalorder %v977_v26, 5 }
 0x27d   :  { %v503_v11 = vpop.xlane.xlu2 %502  ;;  %v517_v5 = vpop.xlane.xlu1 %516 }
 0x27e   :  { %v504_v14 = vrot.slane %v503_v11, 4  ;;  %v518_v16 = vrot.slane %v517_v5, 4 }
 0x280   :  { %v505_v17 = vadd.f32 %v504_v14, %v503_v11  ;;  %v519_v21 = vadd.f32 %v518_v16, %v517_v5 }
 0x282   :  { %v506_v22 = vrot.slane %v505_v17, 2  ;;  %v520_v23 = vrot.slane %v519_v21, 2 }
 0x284   :  { %v507_v27 = vadd.f32 %v506_v22, %v505_v17  ;;  %v521_v28 = vadd.f32 %v520_v23, %v519_v21 }
 0x285   :  { %v556_v29 = vpop.xlane.xlu2 %555 }
 0x286   :  { %v557_v30 = vsub.f32 %v556_v29, %v1082_v56  ;;  %v508_v31 = vrot.slane %v507_v27, 1  ;;  %v522_v32 = vrot.slane %v521_v28, 1 }
 0x288   :  { %v558_v33 = vand.u32 2147483647, %v557_v30  ;;  %v509_v35 = vadd.f32 %v508_v31, %v507_v27  ;;  %v523_v37 = vadd.f32 %v522_v32, %v521_v28 }
 0x28a   :  { %766 = vpush %v509_v35  ;;  %v559_v38 = vsel %vm225_vm1, %v558_v33, 0.0 }
 0x28b   :  { %768 = vpush %v523_v37  ;;  %560 = vadd.xlane.f32.xlu1 %v559_v38 }
 0x29a   :  { %v592_v47 = vpop.xlane.xlu0 %591 }
 0x29b   :  { %v593_v50 = vrot.slane %v592_v47, 4 }
 0x29d   :  { %v594_v52 = vadd.f32 %v593_v50, %v592_v47 }
 0x29f   :  { %v595_v54 = vrot.slane %v594_v52, 2 }
 0x2a0   :  { %v677_v49 = vpop.xlane.xlu2 %676 }
 0x2a1   :  { %v678_v51 = vrot.slane %v677_v49, 4  ;;  %v596_v2 = vadd.f32 %v595_v54, %v594_v52 }
 0x2a3   :  { %v679_v53 = vadd.f32 %v678_v51, %v677_v49  ;;  %v597_v48 = vrot.slane %v596_v2, 1 }
 0x2a5   :  { %v680_v1 = vrot.slane %v679_v53, 2  ;;  %v598_v60 = vadd.f32 %v597_v48, %v596_v2 }
 0x2a7   :  { %v681_v44 = vadd.f32 %v680_v1, %v679_v53 }
 0x2a9   :  { %v682_v58 = vrot.slane %v681_v44, 1 }
 0x2ab   :  { %v683_v61 = vadd.f32 %v682_v58, %v681_v44 }
 0x2bb   :  { %s1220_s29 = spop %766 }
 0x2bc   :  { %s1222_s30 = spop %768 }
 0x2bd   :  { %s527_s10 = smax.f32 %s887_s12, %s1222_s30  ;;  %s526_s12 = smul.f32 100.0, %s1220_s29 }
 0x2be   :  { %v528_v56 = vstv %s527_s10  ;;  %p525_p1 = scmp.gt.f32.partialorder %s1222_s30, 0.0 }
 0x2bf   :  { %826 = vrcp.f32 %v528_v56  ;;  %v540_v20 = vand.u32 2147483648, %v528_v56  ;;  %v538_v40 = vand.u32 2147483647, %v528_v56  ;;  %vm534_vm1 = vweird.f32 %v528_v56 }
 0x2c1   :  { %v541_v42 = vor.u32 1.1754944e-38, %v540_v20  ;;  %vm539_vm15 = vcmp.eq.f32.partialorder %v538_v40, 8.507059e+37 }
 0x2c5   :  { %v827_v39 = vpop.eup %826 }
 0x2c6   :  { %v530_v24 = vmul.f32 %v827_v39, %v528_v56  ;;  %vm535_vm11 = vweird.f32 %v827_v39 }
 0x2c7   :  { %vm536_vm14 = vmor %vm534_vm1, %vm535_vm11 }
 0x2c8   :  { %v531_v19 = vsub.f32 1.0, %v530_v24 }
 0x2ca   :  { %v532_v36 = vmul.f32 %v827_v39, %v531_v19 }
 0x2cc   :  { %v533_v41 = vadd.f32 %v827_v39, %v532_v36 }
 0x2ce   :  { %v537_v46 = vsel %vm536_vm14, %v827_v39, %v533_v41 }
 0x2cf   :  { %v542_v15 = vsel %vm539_vm15, %v541_v42, %v537_v46 }
 0x2d0   :  { %770 = vpush %v542_v15 }
 0x2fe   :  { %v561_v55 = vpop.xlane.xlu1 %560 }
 0x2ff   :  { %v562_v57 = vrot.slane %v561_v55, 4 }
 0x301   :  { %v563_v43 = vadd.f32 %v562_v57, %v561_v55  ;;  %s771_s9 = spop %770 }
 0x302   :  { %s544_s18 = smul.f32 %s771_s9, %s526_s12 }
 0x303   :  { %v564_v34 = vrot.slane %v563_v43, 2 }
 0x304   :  { %s1277_s18 = smov (!%p525_p1, %s544_s18), 100.0 }
 0x305   :  { %v565_v0 = vadd.f32 %v564_v34, %v563_v43  ;;  %v691_v7 = vstv %s1277_s18 }
 0x307   :  { %v566_v45 = vrot.slane %v565_v0, 1 }
 0x309   :  { %v567_v59 = vadd.f32 %v566_v45, %v565_v0 }
 0x30b   :  { %772 = vpush %v567_v59 }
 0x30c   :  { %774 = vpush %v598_v60 }
 0x30d   :  { %776 = vpush %v683_v61 }
 0x33c   :  { %s773_s19 = spop %772 }
 0x33d   :  { %s577_s20 = smul.f32 %s773_s19, %s1152_s0  ;;  %s775_s21 = spop %774 }
 0x33e   :  { %v687_v4 = vstv %s775_s21  ;;  %s777_s23 = spop %776 }
 0x33f   :  { %v693_v13 = vstv %s577_s20  ;;  %v688_v6 = vsel %vm354_vm5, %v687_v4, %v686_v63  ;;  %v689_v12 = vstv %s777_s23 }
 0x340   :  { %v690_v8 = vsel %vm357_vm7, %v689_v12, %v688_v6 }
 0x341   :  { %v692_v3 = vsel %vm360_vm10, %v691_v7, %v690_v8 }
 0x342   :  { %v694_v10 = vsel %vm363_vm12, %v693_v13, %v692_v3 }
 0x343   :  { %v696_v25 = vsel %vm1273_vm3, %v695_v9, %v694_v10 }
 0x344   :  { %698 = vst [vmem:[#allocation2 + $0x1] sm:$0x1] %v696_v25 }
 0x345   :  { %711 = dma.vmem_to_hbm [thread:$0]  %s704_s6, 32, %s706_s26, [#allocation3], %s889_s15, %s889_s15, %s890_s16  }
 0x346   :  { %876 = dma.done.wait [#allocation3], 32  }
 0x347   :  { %877 = vsyncadd [#allocation3], 4294967264 }
 0x348   :  { %878 = dma.done.wait [#allocation5], 32  }
 0x349   :  { %879 = vsyncadd [#allocation5], 4294967264 }
 0x34a   :  { %733 = vsyncpa [#allocation3], 1 }
 0x34b   :  { %734 = vsyncpa [#allocation5], 1 }

</bundles_post_ra>
